<compile_context>
chip_gen: v7x
topology: tpu7x:2x2x1
jax: 0.10.0
libtpu: 0.0.40
codegen_flags: <defaults>
</compile_context>

<pallas_src>
import functools

import jax
import jax.numpy as jnp
import numpy as np
from jax.experimental import pallas as pl
from jax.experimental.pallas import tpu as pltpu


# ----------------------------------------------------------------------------
# helpers
# ----------------------------------------------------------------------------
def _round_up(x, m):
    return (x + m - 1) // m * m


def _tile(dim, align, tmax):
    """Pick a tile (multiple of `align`, <= tmax) and the padded extent.

    Prefers a tile that divides the minimally padded extent so large operands
    are not copy-padded in HBM; falls back to extra padding only if the best
    divisor would be pathologically small.
    """
    dp = _round_up(dim, align)
    t = min(tmax, dp)
    t -= t % align
    cand = t
    while cand >= align:
        if dp % cand == 0:
            return cand, dp
        cand -= align
        if cand < max(align, t // 2):   # divisor too small -> accept padding
            break
    return t, _round_up(dp, t)


def _pad2d(a, rows, cols):
    r, c = a.shape
    if r == rows and c == cols:
        return a
    return jnp.pad(a, ((0, rows - r), (0, cols - c)))


# ----------------------------------------------------------------------------
# Pallas kernel 1: tiled fused GEMM    out = relu?(x @ w + b)
#   - multi-K path: f32 VMEM accumulator, pl.when init/finalize on K axis
#   - single-K fast path: no scratch, no K axis, pure 2-D parallel grid
# ----------------------------------------------------------------------------
def _matmul_bias_kernel(x_ref, w_ref, b_ref, o_ref, acc_ref, *, relu):
    k = pl.program_id(2)

    @pl.when(k == 0)
    def _():
        acc_ref[...] = jnp.zeros_like(acc_ref)

    acc_ref[...] += jnp.dot(x_ref[...], w_ref[...],
                            preferred_element_type=jnp.float32)

    @pl.when(k == pl.num_programs(2) - 1)
    def _():
        out = acc_ref[...] + b_ref[0:1, :]          # f32 epilogue
        if relu:
            out = jnp.maximum(out, 0.0)
        o_ref[...] = out.astype(o_ref.dtype)


def _matmul_bias_1k_kernel(x_ref, w_ref, b_ref, o_ref, *, relu):
    out = jnp.dot(x_ref[...], w_ref[...], preferred_element_type=jnp.float32)
    out = out + b_ref[0:1, :]
    if relu:
        out = jnp.maximum(out, 0.0)
    o_ref[...] = out.astype(o_ref.dtype)


def matmul_bias(x, w, b, *, relu=False, out_dtype=jnp.bfloat16,
                tm_max=256, tn_max=256, tk_max=1024):
    """x:(M,K), w:(K,N), b:(N,)  ->  (M,N) out_dtype. bf16 MXU, f32 accumulate."""
    M, K = x.shape
    K2, N = w.shape
    assert K == K2, (K, K2)

    tm, Mp = _tile(M, 8, tm_max)
    tn, Np = _tile(N, 128, tn_max)
    tk, Kp = _tile(K, 128, tk_max)

    xp = _pad2d(x.astype(jnp.bfloat16), Mp, Kp)
    wp = _pad2d(w.astype(jnp.bfloat16), Kp, Np)
    bp = jnp.broadcast_to(
        jnp.pad(b.astype(jnp.float32), (0, Np - N)).reshape(1, Np), (8, Np))

    out_bytes = jnp.dtype(out_dtype).itemsize
    cost = pl.CostEstimate(
        flops=2 * Mp * Np * Kp,
        transcendentals=0,
        bytes_accessed=(xp.size + wp.size) * 2 + bp.size * 4
        + Mp * Np * out_bytes)

    if Kp == tk:
        # ------- single-K fast path: no accumulator, no reduction axis -------
        grid = (Mp // tm, Np // tn)
        vmem_need = (2 * (tm * Kp + Kp * tn) * 2     # double-buffered bf16 inputs
                     + 2 * 8 * tn * 4                # bias
                     + 2 * tm * tn * out_bytes)      # double-buffered output
        vmem_limit = int(min(max(2 * vmem_need + (2 << 20), 32 << 20), 64 << 20))
        kernel = functools.partial(_matmul_bias_1k_kernel, relu=relu)
        out = pl.pallas_call(
            kernel,
            out_shape=jax.ShapeDtypeStruct((Mp, Np), out_dtype),
            grid_spec=pltpu.PrefetchScalarGridSpec(
                num_scalar_prefetch=0,
                grid=grid,
                in_specs=[
                    pl.BlockSpec((tm, Kp), lambda i, j: (i, 0)),
                    pl.BlockSpec((Kp, tn), lambda i, j: (0, j)),
                    pl.BlockSpec((8, tn), lambda i, j: (0, j)),
                ],
                out_specs=pl.BlockSpec((tm, tn), lambda i, j: (i, j)),
            ),
            compiler_params=pltpu.CompilerParams(
                dimension_semantics=("parallel", "parallel"),
                vmem_limit_bytes=vmem_limit),
            cost_estimate=cost,
        )(xp, wp, bp)
        return out[:M, :N]

    # ----------------- multi-K path: streamed reduction ----------------------
    grid = (Mp // tm, Np // tn, Kp // tk)
    vmem_need = (2 * (tm * tk + tk * tn) * 2         # double-buffered bf16 inputs
                 + 2 * 8 * tn * 4                    # bias
                 + 2 * tm * tn * out_bytes           # double-buffered output
                 + tm * tn * 4)                      # accumulator scratch
    vmem_limit = int(min(max(2 * vmem_need + (2 << 20), 32 << 20), 64 << 20))

    kernel = functools.partial(_matmul_bias_kernel, relu=relu)
    out = pl.pallas_call(
        kernel,
        out_shape=jax.ShapeDtypeStruct((Mp, Np), out_dtype),
        grid_spec=pltpu.PrefetchScalarGridSpec(
            num_scalar_prefetch=0,
            grid=grid,
            in_specs=[
                pl.BlockSpec((tm, tk), lambda i, j, k: (i, k)),
                pl.BlockSpec((tk, tn), lambda i, j, k: (k, j)),
                pl.BlockSpec((8, tn), lambda i, j, k: (0, j)),
            ],
            out_specs=pl.BlockSpec((tm, tn), lambda i, j, k: (i, j)),
            scratch_shapes=[pltpu.VMEM((tm, tn), jnp.float32)],
        ),
        compiler_params=pltpu.CompilerParams(
            dimension_semantics=("parallel", "parallel", "arbitrary"),
            vmem_limit_bytes=vmem_limit),
        cost_estimate=cost,
    )(xp, wp, bp)
    return out[:M, :N]


# ----------------------------------------------------------------------------
# Pallas kernel 2: fused MLP tail   heads = (relu(fc(x) @ Wfc1 + b1)) @ Wh + bh
#   - fc weight streams through a K-loop with an f32 accumulator
#   - fc1 / heads weights stay resident in VMEM; activations never leave VMEM
#   - heads output is one lane-dense slab (896 = 7 * 128 columns)
# ----------------------------------------------------------------------------
def _mlp_tail_kernel(flat_ref, wfc_ref, bfc_ref, wfc1_ref, bfc1_ref,
                     wh_ref, bh_ref, o_ref, acc_ref):
    k = pl.program_id(0)

    @pl.when(k == 0)
    def _():
        acc_ref[...] = jnp.zeros_like(acc_ref)

    acc_ref[...] += jnp.dot(flat_ref[...], wfc_ref[...],
                            preferred_element_type=jnp.float32)

    @pl.when(k == pl.num_programs(0) - 1)
    def _():
        z = (acc_ref[...] + bfc_ref[0:1, :]).astype(jnp.bfloat16)   # fc (no relu)
        z1 = jnp.dot(z, wfc1_ref[...], preferred_element_type=jnp.float32)
        z1 = jnp.maximum(z1 + bfc1_ref[0:1, :], 0.0).astype(jnp.bfloat16)
        h = jnp.dot(z1, wh_ref[...], preferred_element_type=jnp.float32)
        o_ref[...] = h + bh_ref[0:1, :]


def mlp_tail(flat, w_fc, b_fc, w_fc1, b_fc1, w_heads, b_heads, *, tk_max=1024):
    B, K = flat.shape
    K2, Hd = w_fc.shape                       # Hd = 256
    Hd2, NH = w_heads.shape                   # NH = 896 (lane-padded)
    assert K == K2 and Hd == Hd2 and Hd % 128 == 0 and NH % 128 == 0

    Bp = _round_up(B, 8)
    tk, Kp = _tile(K, 128, tk_max)

    flat_p = _pad2d(flat.astype(jnp.bfloat16), Bp, Kp)
    wfc_p = _pad2d(w_fc.astype(jnp.bfloat16), Kp, Hd)
    wfc1 = w_fc1.astype(jnp.bfloat16)
    wh = w_heads.astype(jnp.bfloat16)
    bfc = jnp.broadcast_to(b_fc.astype(jnp.float32).reshape(1, Hd), (8, Hd))
    bfc1 = jnp.broadcast_to(b_fc1.astype(jnp.float32).reshape(1, Hd), (8, Hd))
    bh = jnp.broadcast_to(b_heads.astype(jnp.float32).reshape(1, NH), (8, NH))

    grid = (Kp // tk,)
    vmem_need = (2 * (Bp * tk + tk * Hd) * 2      # streamed flat / fc weight
                 + (Hd * Hd + Hd * NH) * 2        # resident fc1 / heads weights
                 + 8 * (Hd + Hd + NH) * 4         # biases
                 + Bp * NH * 4                    # output block
                 + Bp * Hd * 4)                   # accumulator
    vmem_limit = int(min(max(2 * vmem_need + (2 << 20), 32 << 20), 64 << 20))

    cost = pl.CostEstimate(
        flops=2 * Bp * (Kp * Hd + Hd * Hd + Hd * NH),
        transcendentals=0,
        bytes_accessed=(flat_p.size + wfc_p.size + wfc1.size + wh.size) * 2
        + (bfc.size + bfc1.size + bh.size) * 4 + Bp * NH * 4)

    out = pl.pallas_call(
        _mlp_tail_kernel,
        out_shape=jax.ShapeDtypeStruct((Bp, NH), jnp.float32),
        grid_spec=pltpu.PrefetchScalarGridSpec(
            num_scalar_prefetch=0,
            grid=grid,
            in_specs=[
                pl.BlockSpec((Bp, tk), lambda k: (0, k)),
                pl.BlockSpec((tk, Hd), lambda k: (k, 0)),
                pl.BlockSpec((8, Hd), lambda k: (0, 0)),
                pl.BlockSpec((Hd, Hd), lambda k: (0, 0)),
                pl.BlockSpec((8, Hd), lambda k: (0, 0)),
                pl.BlockSpec((Hd, NH), lambda k: (0, 0)),
                pl.BlockSpec((8, NH), lambda k: (0, 0)),
            ],
            out_specs=pl.BlockSpec((Bp, NH), lambda k: (0, 0)),
            scratch_shapes=[pltpu.VMEM((Bp, Hd), jnp.float32)],
        ),
        compiler_params=pltpu.CompilerParams(
            dimension_semantics=("arbitrary",),
            vmem_limit_bytes=vmem_limit),
        cost_estimate=cost,
    )(flat_p, wfc_p, bfc, wfc1, bfc1, wh, bh)
    return out[:B]


# ----------------------------------------------------------------------------
# Glue: im2col (NHWC) so conv == GEMM
# TODO(synk): fuse the patch gather into the GEMM K-loop (strided pl.ds loads
# from the NHWC input in VMEM) to avoid materializing the 4x patch matrix.
# ----------------------------------------------------------------------------
def im2col(x_nhwc, kh, kw, stride):
    N, H, W, C = x_nhwc.shape
    oh = (H - kh) // stride + 1
    ow = (W - kw) // stride + 1
    patches = []
    for i in range(kh):
        for j in range(kw):
            patches.append(
                x_nhwc[:, i:i + stride * oh:stride, j:j + stride * ow:stride, :])
    p = jnp.stack(patches, axis=3)               # (N, oh, ow, kh*kw, C)
    return p.reshape(N * oh * ow, kh * kw * C), oh, ow


# ----------------------------------------------------------------------------
# Parameter init (deterministic, shapes follow the PyTorch module)
# ----------------------------------------------------------------------------
HEAD_DIMS = [("move", 2), ("angle", 360), ("info", 9), ("attack", 11),
             ("action_type", 3), ("arg1", 360), ("arg2", 100), ("arg3", 5)]
HEADS_TOTAL = sum(d for _, d in HEAD_DIMS)        # 850
HEADS_PADDED = _round_up(HEADS_TOTAL, 128)        # 896 = 7 * 128 (lane-dense)


def _xavier_uniform(key, shape_ocickhkw):
    oc, ic, kh, kw = shape_ocickhkw
    fan_in, fan_out = ic * kh * kw, oc * kh * kw
    bound = (6.0 / (fan_in + fan_out)) ** 0.5
    return jax.random.uniform(key, shape_ocickhkw, jnp.float32, -bound, bound)


def _linear_init(key, in_f, out_f):
    kw_, kb_ = jax.random.split(key)
    bound = 1.0 / (in_f ** 0.5)
    w = jax.random.uniform(kw_, (out_f, in_f), jnp.float32, -bound, bound)
    b = jax.random.uniform(kb_, (out_f,), jnp.float32, -bound, bound)
    return w.T, b  # store as (in, out)


def init_params(key, oh2, ow2):
    conv_output_size = 128 * oh2 * ow2
    keys = jax.random.split(key, 4 + len(HEAD_DIMS))
    params = {}

    # conv1: (64, 3, 8, 8), xavier_uniform weight, zero bias -> GEMM layout
    w1 = _xavier_uniform(keys[0], (64, 3, 8, 8))
    params["w_conv1"] = jnp.transpose(w1, (2, 3, 1, 0)).reshape(
        8 * 8 * 3, 64).astype(jnp.bfloat16)
    params["b_conv1"] = jnp.zeros((64,), jnp.float32)

    # conv2: (128, 64, 4, 4)
    w2 = _xavier_uniform(keys[1], (128, 64, 4, 4))
    params["w_conv2"] = jnp.transpose(w2, (2, 3, 1, 0)).reshape(
        4 * 4 * 64, 128).astype(jnp.bfloat16)
    params["b_conv2"] = jnp.zeros((128,), jnp.float32)

    # fc consumes PyTorch's NCHW flatten (c, h, w).  We feed the NHWC flatten
    # instead and permute its rows ONCE here -> no runtime transpose of the
    # conv2 activation.
    w_fc_pt, b_fc = _linear_init(keys[2], conv_output_size, 256)
    perm = jnp.arange(conv_output_size).reshape(128, oh2, ow2)
    perm = jnp.transpose(perm, (1, 2, 0)).reshape(-1)   # (h,w,c) -> (c,h,w) row
    params["w_fc"] = w_fc_pt[perm].astype(jnp.bfloat16)
    params["b_fc"] = b_fc

    w_fc1, b_fc1 = _linear_init(keys[3], 256, 256)
    params["w_fc1"] = w_fc1.astype(jnp.bfloat16)
    params["b_fc1"] = b_fc1

    # all 8 output heads fused into one lane-dense GEMM, padded 850 -> 896
    head_ws, head_bs = [], []
    for k, (_, d) in zip(keys[4:], HEAD_DIMS):
        w, b = _linear_init(k, 256, d)
        head_ws.append(w)
        head_bs.append(b)
    w_heads = jnp.concatenate(head_ws, axis=1)           # (256, 850)
    b_heads = jnp.concatenate(head_bs, axis=0)           # (850,)
    params["w_heads"] = jnp.pad(
        w_heads, ((0, 0), (0, HEADS_PADDED - HEADS_TOTAL))).astype(jnp.bfloat16)
    params["b_heads"] = jnp.pad(b_heads, (0, HEADS_PADDED - HEADS_TOTAL))
    return params


# ----------------------------------------------------------------------------
# Forward pass (matches NetDQN.forward semantics)
# ----------------------------------------------------------------------------
def net_dqn_forward(params, x_nchw):
    N = x_nchw.shape[0]
    x = jnp.transpose(x_nchw, (0, 2, 3, 1)).astype(jnp.bfloat16)  # NCHW->NHWC

    # conv1 + relu (im2col glue + tiled fused Pallas GEMM)
    p1, oh1, ow1 = im2col(x, 8, 8, 4)
    h1 = matmul_bias(p1, params["w_conv1"], params["b_conv1"], relu=True)
    h1 = h1.reshape(N, oh1, ow1, 64)

    # conv2 + relu
    p2, oh2, ow2 = im2col(h1, 4, 4, 2)
    h2 = matmul_bias(p2, params["w_conv2"], params["b_conv2"], relu=True)

    # NHWC flatten feeds the row-permuted fc directly (no NCHW transpose).
    flat = h2.reshape(N, oh2 * ow2 * 128)

    # fc -> fc1(+relu) -> 8 fused heads, one Pallas call, lane-padded output.
    heads = mlp_tail(flat, params["w_fc"], params["b_fc"],
                     params["w_fc1"], params["b_fc1"],
                     params["w_heads"], params["b_heads"])

    outs, off = [], 0
    for _, d in HEAD_DIMS:
        outs.append(heads[:, off:off + d])
        off += d
    return tuple(outs)


# pure-JAX f32 reference (same parameter layouts) for a loose sanity check
def net_dqn_reference(params, x_nchw):
    N = x_nchw.shape[0]
    x = jnp.transpose(x_nchw, (0, 2, 3, 1)).astype(jnp.float32)
    p1, oh1, ow1 = im2col(x, 8, 8, 4)
    h1 = jnp.maximum(p1 @ params["w_conv1"].astype(jnp.float32)
                     + params["b_conv1"], 0.0).reshape(N, oh1, ow1, 64)
    p2, oh2, ow2 = im2col(h1, 4, 4, 2)
    h2 = jnp.maximum(p2 @ params["w_conv2"].astype(jnp.float32)
                     + params["b_conv2"], 0.0)
    flat = h2.reshape(N, -1)
    z = flat @ params["w_fc"].astype(jnp.float32) + params["b_fc"]
    z = jnp.maximum(z @ params["w_fc1"].astype(jnp.float32)
                    + params["b_fc1"], 0.0)
    heads = z @ params["w_heads"].astype(jnp.float32) + params["b_heads"]
    outs, off = [], 0
    for _, d in HEAD_DIMS:
        outs.append(heads[:, off:off + d])
        off += d
    return tuple(outs)


# ----------------------------------------------------------------------------
if __name__ == "__main__":
    BATCH, CH, H, W = 2, 3, 48, 48

    # same arithmetic as NetDQN._get_conv_output_size, applied to the demo size
    oh1 = (H - 8) // 4 + 1
    ow1 = (W - 8) // 4 + 1
    oh2 = (oh1 - 4) // 2 + 1
    ow2 = (ow1 - 4) // 2 + 1

    key = jax.random.PRNGKey(0)
    k_params, k_x = jax.random.split(key)
    params = init_params(k_params, oh2, ow2)
    x = jax.random.normal(k_x, (BATCH, CH, H, W), jnp.float32)

    fwd = jax.jit(net_dqn_forward)
    outs = jax.block_until_ready(fwd(params, x))

    expected = [(BATCH, d) for _, d in HEAD_DIMS]
    assert [o.shape for o in outs] == expected, [o.shape for o in outs]

    # loose numerical sanity check (bf16 MXU path vs f32 reference)
    refs = jax.block_until_ready(net_dqn_reference(params, x))
    for o, r in zip(outs, refs):
        np.testing.assert_allclose(np.asarray(o, np.float32),
                                   np.asarray(r, np.float32),
                                   rtol=0.1, atol=0.1)

    print("KERNEL_OK")
</pallas_src>

<mosaic_0001>
module attributes {stable_mosaic.version = 11 : i64} {
  func.func @_matmul_bias_1k_kernel(%arg0: i32, %arg1: i32, %arg2: memref<248x256xbf16, #tpu.memory_space<vmem>>, %arg3: memref<256x128xbf16, #tpu.memory_space<vmem>>, %arg4: memref<8x128xf32, #tpu.memory_space<vmem>>, %arg5: memref<248x128xbf16, #tpu.memory_space<vmem>>) attributes {dimension_semantics = [#tpu.dimension_semantics<parallel>, #tpu.dimension_semantics<parallel>], iteration_bounds = array<i64: 1, 1>, scalar_prefetch = 0 : i64, scratch_operands = 0 : i64, tpu.core_type = #tpu.core_type<tc>, window_params = [{transform_indices = @transform_0, window_bounds = array<i64: 248, 256>}, {transform_indices = @transform_1, window_bounds = array<i64: 256, 128>}, {transform_indices = @transform_2, window_bounds = array<i64: 8, 128>}, {transform_indices = @transform_3, window_bounds = array<i64: 248, 128>}]} {
    %c0 = arith.constant 0 : index
    %c0_0 = arith.constant 0 : index
    %0 = vector.load %arg2[%c0, %c0_0] : memref<248x256xbf16, #tpu.memory_space<vmem>>, vector<248x256xbf16>
    %c0_1 = arith.constant 0 : index
    %c0_2 = arith.constant 0 : index
    %1 = vector.load %arg3[%c0_1, %c0_2] : memref<256x128xbf16, #tpu.memory_space<vmem>>, vector<256x128xbf16>
    %cst = arith.constant dense<0.000000e+00> : vector<248x128xf32>
    %2 = tpu.matmul %0, %1, %cst {dimension_numbers = #tpu.dot_dimension_numbers<[1], [0], [0], [1], [0, 0, 1, 1], [], []>} : vector<248x256xbf16>, vector<256x128xbf16>, vector<248x128xf32> -> vector<248x128xf32>
    %c0_3 = arith.constant 0 : index
    %c0_4 = arith.constant 0 : index
    %3 = vector.load %arg4[%c0_3, %c0_4] : memref<8x128xf32, #tpu.memory_space<vmem>>, vector<1x128xf32>
    %4 = vector.broadcast %3 : vector<1x128xf32> to vector<248x128xf32>
    %5 = arith.addf %2, %4 : vector<248x128xf32>
    %cst_5 = arith.constant 0.000000e+00 : f32
    %6 = vector.broadcast %cst_5 : f32 to vector<248x128xf32>
    %7 = arith.maximumf %5, %6 : vector<248x128xf32>
    %8 = arith.truncf %7 : vector<248x128xf32> to vector<248x128xbf16>
    %c0_6 = arith.constant 0 : index
    %c0_7 = arith.constant 0 : index
    %9 = vector.load %arg5[%c0_6, %c0_7] : memref<248x128xbf16, #tpu.memory_space<vmem>>, vector<248x128xbf16>
    tpu.vector_store %arg5[%c0_6, %c0_7], %8 {strides = array<i32>} : memref<248x128xbf16, #tpu.memory_space<vmem>>, vector<248x128xbf16>,
    return
  }
  func.func @transform_0(%arg0: i32, %arg1: i32) -> (i32, i32) {
    %c0_i32 = arith.constant 0 : i32
    %c0_i32_0 = arith.constant 0 : i32
    return %arg0, %c0_i32 : i32, i32
  }
  func.func @transform_1(%arg0: i32, %arg1: i32) -> (i32, i32) {
    %c0_i32 = arith.constant 0 : i32
    %c0_i32_0 = arith.constant 0 : i32
    return %c0_i32, %arg1 : i32, i32
  }
  func.func @transform_2(%arg0: i32, %arg1: i32) -> (i32, i32) {
    %c0_i32 = arith.constant 0 : i32
    %c0_i32_0 = arith.constant 0 : i32
    return %c0_i32, %arg1 : i32, i32
  }
  func.func @transform_3(%arg0: i32, %arg1: i32) -> (i32, i32) {
    %c0_i32 = arith.constant 0 : i32
    return %arg0, %arg1 : i32, i32
  }
}

module attributes {stable_mosaic.version = 11 : i64} {
  func.func @_matmul_bias_1k_kernel(%arg0: i32, %arg1: i32, %arg2: memref<32x1024xbf16, #tpu.memory_space<vmem>>, %arg3: memref<1024x128xbf16, #tpu.memory_space<vmem>>, %arg4: memref<8x128xf32, #tpu.memory_space<vmem>>, %arg5: memref<32x128xbf16, #tpu.memory_space<vmem>>) attributes {dimension_semantics = [#tpu.dimension_semantics<parallel>, #tpu.dimension_semantics<parallel>], iteration_bounds = array<i64: 1, 1>, scalar_prefetch = 0 : i64, scratch_operands = 0 : i64, tpu.core_type = #tpu.core_type<tc>, window_params = [{transform_indices = @transform_0, window_bounds = array<i64: 32, 1024>}, {transform_indices = @transform_1, window_bounds = array<i64: 1024, 128>}, {transform_indices = @transform_2, window_bounds = array<i64: 8, 128>}, {transform_indices = @transform_3, window_bounds = array<i64: 32, 128>}]} {
    %c0 = arith.constant 0 : index
    %c0_0 = arith.constant 0 : index
    %0 = vector.load %arg2[%c0, %c0_0] : memref<32x1024xbf16, #tpu.memory_space<vmem>>, vector<32x1024xbf16>
    %c0_1 = arith.constant 0 : index
    %c0_2 = arith.constant 0 : index
    %1 = vector.load %arg3[%c0_1, %c0_2] : memref<1024x128xbf16, #tpu.memory_space<vmem>>, vector<1024x128xbf16>
    %cst = arith.constant dense<0.000000e+00> : vector<32x128xf32>
    %2 = tpu.matmul %0, %1, %cst {dimension_numbers = #tpu.dot_dimension_numbers<[1], [0], [0], [1], [0, 0, 1, 1], [], []>} : vector<32x1024xbf16>, vector<1024x128xbf16>, vector<32x128xf32> -> vector<32x128xf32>
    %c0_3 = arith.constant 0 : index
    %c0_4 = arith.constant 0 : index
    %3 = vector.load %arg4[%c0_3, %c0_4] : memref<8x128xf32, #tpu.memory_space<vmem>>, vector<1x128xf32>
    %4 = vector.broadcast %3 : vector<1x128xf32> to vector<32x128xf32>
    %5 = arith.addf %2, %4 : vector<32x128xf32>
    %cst_5 = arith.constant 0.000000e+00 : f32
    %6 = vector.broadcast %cst_5 : f32 to vector<32x128xf32>
    %7 = arith.maximumf %5, %6 : vector<32x128xf32>
    %8 = arith.truncf %7 : vector<32x128xf32> to vector<32x128xbf16>
    %c0_6 = arith.constant 0 : index
    %c0_7 = arith.constant 0 : index
    %9 = vector.load %arg5[%c0_6, %c0_7] : memref<32x128xbf16, #tpu.memory_space<vmem>>, vector<32x128xbf16>
    tpu.vector_store %arg5[%c0_6, %c0_7], %8 {strides = array<i32>} : memref<32x128xbf16, #tpu.memory_space<vmem>>, vector<32x128xbf16>,
    return
  }
  func.func @transform_0(%arg0: i32, %arg1: i32) -> (i32, i32) {
    %c0_i32 = arith.constant 0 : i32
    %c0_i32_0 = arith.constant 0 : i32
    return %arg0, %c0_i32 : i32, i32
  }
  func.func @transform_1(%arg0: i32, %arg1: i32) -> (i32, i32) {
    %c0_i32 = arith.constant 0 : i32
    %c0_i32_0 = arith.constant 0 : i32
    return %c0_i32, %arg1 : i32, i32
  }
  func.func @transform_2(%arg0: i32, %arg1: i32) -> (i32, i32) {
    %c0_i32 = arith.constant 0 : i32
    %c0_i32_0 = arith.constant 0 : i32
    return %c0_i32, %arg1 : i32, i32
  }
  func.func @transform_3(%arg0: i32, %arg1: i32) -> (i32, i32) {
    %c0_i32 = arith.constant 0 : i32
    return %arg0, %arg1 : i32, i32
  }
}

module attributes {stable_mosaic.version = 11 : i64} {
  func.func @_mlp_tail_kernel(%arg0: i32, %arg1: memref<8x1024xbf16, #tpu.memory_space<vmem>>, %arg2: memref<1024x256xbf16, #tpu.memory_space<vmem>>, %arg3: memref<8x256xf32, #tpu.memory_space<vmem>>, %arg4: memref<256x256xbf16, #tpu.memory_space<vmem>>, %arg5: memref<8x256xf32, #tpu.memory_space<vmem>>, %arg6: memref<256x896xbf16, #tpu.memory_space<vmem>>, %arg7: memref<8x896xf32, #tpu.memory_space<vmem>>, %arg8: memref<8x896xf32, #tpu.memory_space<vmem>>, %arg9: memref<8x256xf32, #tpu.memory_space<vmem>>) attributes {dimension_semantics = [#tpu.dimension_semantics<arbitrary>], iteration_bounds = array<i64: 2>, scalar_prefetch = 0 : i64, scratch_operands = 1 : i64, tpu.core_type = #tpu.core_type<tc>, window_params = [{transform_indices = @transform_0, window_bounds = array<i64: 8, 1024>}, {transform_indices = @transform_1, window_bounds = array<i64: 1024, 256>}, {pipeline_mode = #tpu.pipeline_mode<synchronous>, transform_indices = @transform_2, window_bounds = array<i64: 8, 256>}, {pipeline_mode = #tpu.pipeline_mode<synchronous>, transform_indices = @transform_3, window_bounds = array<i64: 256, 256>}, {pipeline_mode = #tpu.pipeline_mode<synchronous>, transform_indices = @transform_4, window_bounds = array<i64: 8, 256>}, {pipeline_mode = #tpu.pipeline_mode<synchronous>, transform_indices = @transform_5, window_bounds = array<i64: 256, 896>}, {pipeline_mode = #tpu.pipeline_mode<synchronous>, transform_indices = @transform_6, window_bounds = array<i64: 8, 896>}, {pipeline_mode = #tpu.pipeline_mode<synchronous>, transform_indices = @transform_7, window_bounds = array<i64: 8, 896>}]} {
    %c0_i32 = arith.constant 0 : i32
    %0 = arith.cmpi eq, %arg0, %c0_i32 : i32
    %1 = arith.extui %0 : i1 to i32
    %c0_i32_0 = arith.constant 0 : i32
    %2 = arith.cmpi ne, %1, %c0_i32_0 : i32
    scf.if %2 {
      %cst_9 = arith.constant 0.000000e+00 : f32
      %12 = vector.broadcast %cst_9 : f32 to vector<8x256xf32>
      %c0_10 = arith.constant 0 : index
      %c0_11 = arith.constant 0 : index
      %13 = vector.load %arg9[%c0_10, %c0_11] : memref<8x256xf32, #tpu.memory_space<vmem>>, vector<8x256xf32>
      tpu.vector_store %arg9[%c0_10, %c0_11], %12 {strides = array<i32>} : memref<8x256xf32, #tpu.memory_space<vmem>>, vector<8x256xf32>,
    } else {
    }
    %c0 = arith.constant 0 : index
    %c0_1 = arith.constant 0 : index
    %3 = vector.load %arg9[%c0, %c0_1] : memref<8x256xf32, #tpu.memory_space<vmem>>, vector<8x256xf32>
    %c0_2 = arith.constant 0 : index
    %c0_3 = arith.constant 0 : index
    %4 = vector.load %arg1[%c0_2, %c0_3] : memref<8x1024xbf16, #tpu.memory_space<vmem>>, vector<8x1024xbf16>
    %c0_4 = arith.constant 0 : index
    %c0_5 = arith.constant 0 : index
    %5 = vector.load %arg2[%c0_4, %c0_5] : memref<1024x256xbf16, #tpu.memory_space<vmem>>, vector<1024x256xbf16>
    %cst = arith.constant dense<0.000000e+00> : vector<8x256xf32>
    %6 = tpu.matmul %4, %5, %cst {dimension_numbers = #tpu.dot_dimension_numbers<[1], [0], [0], [1], [0, 0, 1, 1], [], []>} : vector<8x1024xbf16>, vector<1024x256xbf16>, vector<8x256xf32> -> vector<8x256xf32>
    %7 = arith.addf %3, %6 : vector<8x256xf32>
    %c0_6 = arith.constant 0 : index
    %c0_7 = arith.constant 0 : index
    %8 = vector.load %arg9[%c0_6, %c0_7] : memref<8x256xf32, #tpu.memory_space<vmem>>, vector<8x256xf32>
    tpu.vector_store %arg9[%c0_6, %c0_7], %7 {strides = array<i32>} : memref<8x256xf32, #tpu.memory_space<vmem>>, vector<8x256xf32>,
    %c1_i32 = arith.constant 1 : i32
    %9 = arith.cmpi eq, %arg0, %c1_i32 : i32
    %10 = arith.extui %9 : i1 to i32
    %c0_i32_8 = arith.constant 0 : i32
    %11 = arith.cmpi ne, %10, %c0_i32_8 : i32
    scf.if %11 {
      %c0_9 = arith.constant 0 : index
      %c0_10 = arith.constant 0 : index
      %12 = vector.load %arg9[%c0_9, %c0_10] : memref<8x256xf32, #tpu.memory_space<vmem>>, vector<8x256xf32>
      %c0_11 = arith.constant 0 : index
      %c0_12 = arith.constant 0 : index
      %13 = vector.load %arg3[%c0_11, %c0_12] : memref<8x256xf32, #tpu.memory_space<vmem>>, vector<1x256xf32>
      %14 = vector.broadcast %13 : vector<1x256xf32> to vector<8x256xf32>
      %15 = arith.addf %12, %14 : vector<8x256xf32>
      %16 = arith.truncf %15 : vector<8x256xf32> to vector<8x256xbf16>
      %c0_13 = arith.constant 0 : index
      %c0_14 = arith.constant 0 : index
      %17 = vector.load %arg4[%c0_13, %c0_14] : memref<256x256xbf16, #tpu.memory_space<vmem>>, vector<256x256xbf16>
      %cst_15 = arith.constant dense<0.000000e+00> : vector<8x256xf32>
      %18 = tpu.matmul %16, %17, %cst_15 {dimension_numbers = #tpu.dot_dimension_numbers<[1], [0], [0], [1], [0, 0, 1, 1], [], []>} : vector<8x256xbf16>, vector<256x256xbf16>, vector<8x256xf32> -> vector<8x256xf32>
      %c0_16 = arith.constant 0 : index
      %c0_17 = arith.constant 0 : index
      %19 = vector.load %arg5[%c0_16, %c0_17] : memref<8x256xf32, #tpu.memory_space<vmem>>, vector<1x256xf32>
      %20 = vector.broadcast %19 : vector<1x256xf32> to vector<8x256xf32>
      %21 = arith.addf %18, %20 : vector<8x256xf32>
      %cst_18 = arith.constant 0.000000e+00 : f32
      %22 = vector.broadcast %cst_18 : f32 to vector<8x256xf32>
      %23 = arith.maximumf %21, %22 : vector<8x256xf32>
      %24 = arith.truncf %23 : vector<8x256xf32> to vector<8x256xbf16>
      %c0_19 = arith.constant 0 : index
      %c0_20 = arith.constant 0 : index
      %25 = vector.load %arg6[%c0_19, %c0_20] : memref<256x896xbf16, #tpu.memory_space<vmem>>, vector<256x896xbf16>
      %cst_21 = arith.constant dense<0.000000e+00> : vector<8x896xf32>
      %26 = tpu.matmul %24, %25, %cst_21 {dimension_numbers = #tpu.dot_dimension_numbers<[1], [0], [0], [1], [0, 0, 1, 1], [], []>} : vector<8x256xbf16>, vector<256x896xbf16>, vector<8x896xf32> -> vector<8x896xf32>
      %c0_22 = arith.constant 0 : index
      %c0_23 = arith.constant 0 : index
      %27 = vector.load %arg7[%c0_22, %c0_23] : memref<8x896xf32, #tpu.memory_space<vmem>>, vector<1x896xf32>
      %28 = vector.broadcast %27 : vector<1x896xf32> to vector<8x896xf32>
      %29 = arith.addf %26, %28 : vector<8x896xf32>
      %c0_24 = arith.constant 0 : index
      %c0_25 = arith.constant 0 : index
      %30 = vector.load %arg8[%c0_24, %c0_25] : memref<8x896xf32, #tpu.memory_space<vmem>>, vector<8x896xf32>
      tpu.vector_store %arg8[%c0_24, %c0_25], %29 {strides = array<i32>} : memref<8x896xf32, #tpu.memory_space<vmem>>, vector<8x896xf32>,
    } else {
    }
    return
  }
  func.func @transform_0(%arg0: i32) -> (i32, i32) {
    %c0_i32 = arith.constant 0 : i32
    %c0_i32_0 = arith.constant 0 : i32
    return %c0_i32, %arg0 : i32, i32
  }
  func.func @transform_1(%arg0: i32) -> (i32, i32) {
    %c0_i32 = arith.constant 0 : i32
    %c0_i32_0 = arith.constant 0 : i32
    return %arg0, %c0_i32 : i32, i32
  }
  func.func @transform_2(%arg0: i32) -> (i32, i32) {
    %c0_i32 = arith.constant 0 : i32
    %c0_i32_0 = arith.constant 0 : i32
    %c0_i32_1 = arith.constant 0 : i32
    return %c0_i32, %c0_i32_0 : i32, i32
  }
  func.func @transform_3(%arg0: i32) -> (i32, i32) {
    %c0_i32 = arith.constant 0 : i32
    %c0_i32_0 = arith.constant 0 : i32
    %c0_i32_1 = arith.constant 0 : i32
    return %c0_i32, %c0_i32_0 : i32, i32
  }
  func.func @transform_4(%arg0: i32) -> (i32, i32) {
    %c0_i32 = arith.constant 0 : i32
    %c0_i32_0 = arith.constant 0 : i32
    %c0_i32_1 = arith.constant 0 : i32
    return %c0_i32, %c0_i32_0 : i32, i32
  }
  func.func @transform_5(%arg0: i32) -> (i32, i32) {
    %c0_i32 = arith.constant 0 : i32
    %c0_i32_0 = arith.constant 0 : i32
    %c0_i32_1 = arith.constant 0 : i32
    return %c0_i32, %c0_i32_0 : i32, i32
  }
  func.func @transform_6(%arg0: i32) -> (i32, i32) {
    %c0_i32 = arith.constant 0 : i32
    %c0_i32_0 = arith.constant 0 : i32
    %c0_i32_1 = arith.constant 0 : i32
    return %c0_i32, %c0_i32_0 : i32, i32
  }
  func.func @transform_7(%arg0: i32) -> (i32, i32) {
    %c0_i32 = arith.constant 0 : i32
    %c0_i32_0 = arith.constant 0 : i32
    %c0_i32_1 = arith.constant 0 : i32
    return %c0_i32, %c0_i32_0 : i32, i32
  }
}

</mosaic_0001>

<bundles_post_ra>
// kernel: net_dqn_forward.3
= control target key start
LH: loop header
LB: loop body
LE: loop exit
PB: predicated region body
PF: predicated region fallthrough
CT: control target
= control target key end

     0   :  { %s1323_s1 = inlined_call_operand.vmem [shape: bf16[256,128], index: 1, kind: input, shape index: {}]   ;;  %s1324_s0 = inlined_call_operand.vmem [shape: bf16[248,256], index: 0, kind: input, shape index: {}]   ;;  %s1325_s2 = inlined_call_operand.vmem [shape: f32[8,128], index: 2, kind: input, shape index: {}]   ;;  %s1326_s3 = inlined_call_operand.vmem [shape: bf16[248,128], index: 3, kind: output, shape index: {}]  }
   0x1   :  { %v1015_v0 = vld [vmem:[%s1323_s1 + $0x40] sm:$0xff]   ;;  %v1017_v2 = vld [vmem:[%s1323_s1 + $0x48] sm:$0xff]   ;;  %v1019_v4 = vld [vmem:[%s1323_s1 + $0x50] sm:$0xff]  }
   0x2   :  { %v1016_v1 = vld [vmem:[%s1323_s1] sm:$0xff]   ;;  %887 = vmatprep.subr.bf16.mxu0 %v1015_v0  ;;  %999 = vmatprep.subr.bf16.mxu1 %v1015_v0  ;;  %v1018_v3 = vld [vmem:[%s1323_s1 + $0x8] sm:$0xff]   ;;  %v1020_v5 = vld [vmem:[%s1323_s1 + $0x10] sm:$0xff]  }
   0x3   :  { %888 = vmatpush3.bf16.msra.mxu0 %v1016_v1  ;;  %1007 = vmatpush3.bf16.msra.mxu1 %v1016_v1  ;;  %v1021_v6 = vld [vmem:[%s1323_s1 + $0x58] sm:$0xff]   ;;  %v1023_v8 = vld [vmem:[%s1323_s1 + $0x60] sm:$0xff]   ;;  %v1025_v10 = vld [vmem:[%s1323_s1 + $0x68] sm:$0xff]  }
   0x4   :  { %889 = vmatprep.subr.bf16.mxu0 %v1017_v2  ;;  %1000 = vmatprep.subr.bf16.mxu1 %v1017_v2  ;;  %v1022_v7 = vld [vmem:[%s1323_s1 + $0x18] sm:$0xff]   ;;  %v1024_v9 = vld [vmem:[%s1323_s1 + $0x20] sm:$0xff]   ;;  %v1026_v13 = vld [vmem:[%s1323_s1 + $0x28] sm:$0xff]  }
   0x5   :  { %v1033_v11 = vld [vmem:[%s1324_s0 + $0x4] ss:$8 sps:$4 sm:$0xff]   ;;  %v1027_v14 = vld [vmem:[%s1323_s1 + $0x70] sm:$0xff]   ;;  %v1029_v16 = vld [vmem:[%s1323_s1 + $0x78] sm:$0xff]  }
   0x6   :  { %v1036_v12 = vld [vmem:[%s1324_s0 + $0x84] ss:$8 sps:$4 sm:$0xff]   ;;  %368 = vmatprep.mubr.bf16.mxu0 %v1033_v11  ;;  %v1028_v15 = vld [vmem:[%s1323_s1 + $0x30] sm:$0xff]   ;;  %v1030_v17 = vld [vmem:[%s1323_s1 + $0x38] sm:$0xff]  }
   0x7   :  { %890 = vmatpush3.bf16.msra.mxu0 %v1018_v3  ;;  %1008 = vmatpush3.bf16.msra.mxu1 %v1018_v3  ;;  %v1031_v18 = vld [vmem:[%s1324_s0] ss:$8 sps:$4 sm:$0xff]   ;;  %v1037_v20 = vld [vmem:[%s1324_s0 + $0x14] ss:$8 sps:$4 sm:$0xff]   ;;  %v1041_v22 = vld [vmem:[%s1324_s0 + $0x10] ss:$8 sps:$4 sm:$0xff]  }
   0x8   :  { %891 = vmatprep.subr.bf16.mxu0 %v1019_v4  ;;  %1001 = vmatprep.subr.bf16.mxu1 %v1019_v4  ;;  %v1034_v19 = vld [vmem:[%s1324_s0 + $0x80] ss:$8 sps:$4 sm:$0xff]   ;;  %v1039_v21 = vld [vmem:[%s1324_s0 + $0x94] ss:$8 sps:$4 sm:$0xff]   ;;  %v1042_v23 = vld [vmem:[%s1324_s0 + $0x90] ss:$8 sps:$4 sm:$0xff]  }
   0x9   :  { %432 = vmatprep.mubr.bf16.mxu1 %v1036_v12  ;;  %v1043_v24 = vld [vmem:[%s1324_s0 + $0x24] ss:$8 sps:$4 sm:$0xff]   ;;  %v1047_v26 = vld [vmem:[%s1324_s0 + $0x20] ss:$8 sps:$4 sm:$0xff]   ;;  %v1049_v28 = vld [vmem:[%s1324_s0 + $0x34] ss:$8 sps:$4 sm:$0xff]  }
   0xa   :  { %v1045_v25 = vld [vmem:[%s1324_s0 + $0xa4] ss:$8 sps:$4 sm:$0xff]   ;;  %v1048_v27 = vld [vmem:[%s1324_s0 + $0xa0] ss:$8 sps:$4 sm:$0xff]   ;;  %v1051_v29 = vld [vmem:[%s1324_s0 + $0xb4] ss:$8 sps:$4 sm:$0xff]  }
   0xb   :  { %892 = vmatpush3.bf16.msra.mxu0 %v1020_v5  ;;  %1009 = vmatpush3.bf16.msra.mxu1 %v1020_v5  ;;  %v1053_v30 = vld [vmem:[%s1324_s0 + $0x30] ss:$8 sps:$4 sm:$0xff]   ;;  %v1055_v32 = vld [vmem:[%s1324_s0 + $0x44] ss:$8 sps:$4 sm:$0xff]   ;;  %v1059_v34 = vld [vmem:[%s1324_s0 + $0x40] ss:$8 sps:$4 sm:$0xff]  }
   0xc   :  { %893 = vmatprep.subr.bf16.mxu0 %v1021_v6  ;;  %1002 = vmatprep.subr.bf16.mxu1 %v1021_v6  ;;  %v1054_v31 = vld [vmem:[%s1324_s0 + $0xb0] ss:$8 sps:$4 sm:$0xff]   ;;  %v1057_v33 = vld [vmem:[%s1324_s0 + $0xc4] ss:$8 sps:$4 sm:$0xff]   ;;  %v1060_v35 = vld [vmem:[%s1324_s0 + $0xc0] ss:$8 sps:$4 sm:$0xff]  }
   0xd   :  { %v1061_v36 = vld [vmem:[%s1324_s0 + $0x54] ss:$8 sps:$4 sm:$0xff]   ;;  %v1065_v38 = vld [vmem:[%s1324_s0 + $0x50] ss:$8 sps:$4 sm:$0xff]   ;;  %v1067_v40 = vld [vmem:[%s1324_s0 + $0x64] ss:$8 sps:$4 sm:$0xff]  }
   0xe   :  { %v1063_v37 = vld [vmem:[%s1324_s0 + $0xd4] ss:$8 sps:$4 sm:$0xff]   ;;  %v1066_v39 = vld [vmem:[%s1324_s0 + $0xd0] ss:$8 sps:$4 sm:$0xff]   ;;  %v1069_v41 = vld [vmem:[%s1324_s0 + $0xe4] ss:$8 sps:$4 sm:$0xff]  }
   0xf   :  { %894 = vmatpush3.bf16.msra.mxu0 %v1022_v7  ;;  %1010 = vmatpush3.bf16.msra.mxu1 %v1022_v7  ;;  %v45_v42 = vld [vmem:[%s1324_s0 + $0xf0] sm:$0xff]  ;;  %v1071_v43 = vld [vmem:[%s1324_s0 + $0x60] ss:$8 sps:$4 sm:$0xff]  }
  0x10   :  { %895 = vmatprep.subr.bf16.mxu0 %v1023_v8  ;;  %1003 = vmatprep.subr.bf16.mxu1 %v1023_v8  ;;  %v1072_v44 = vld [vmem:[%s1324_s0 + $0xe0] ss:$8 sps:$4 sm:$0xff]   ;;  %v1073_v45 = vld [vmem:[%s1324_s0 + $0x74] ss:$8 sps:$4 sm:$0xff]   ;;  %v719_v46 = vcombine.high %v45_v42, %v45_v42  ;;  %v1076_v47 = vld [vmem:[%s1324_s0 + $0x70] ss:$8 sps:$4 sm:$0xff]   ;;  %v718_v48 = vcombine.low %v45_v42, %v45_v42 }
  0x11   :  { %v1242_v51 = vld [vmem:[%s1325_s2] ss:$0 sm:$0xff] }
  0x13   :  { %896 = vmatpush3.bf16.msra.mxu0 %v1024_v9  ;;  %1011 = vmatpush3.bf16.msra.mxu1 %v1024_v9 }
  0x14   :  { %897 = vmatprep.subr.bf16.mxu0 %v1025_v10  ;;  %1004 = vmatprep.subr.bf16.mxu1 %v1025_v10 }
  0x17   :  { %898 = vmatpush3.bf16.msra.mxu0 %v1026_v13  ;;  %1012 = vmatpush3.bf16.msra.mxu1 %v1026_v13 }
  0x18   :  { %899 = vmatprep.subr.bf16.mxu0 %v1027_v14  ;;  %1005 = vmatprep.subr.bf16.mxu1 %v1027_v14 }
  0x1b   :  { %900 = vmatpush3.bf16.msra.mxu0 %v1028_v15  ;;  %1013 = vmatpush3.bf16.msra.mxu1 %v1028_v15 }
  0x1c   :  { %901 = vmatprep.subr.bf16.mxu0 %v1029_v16  ;;  %1006 = vmatprep.subr.bf16.mxu1 %v1029_v16 }
  0x1f   :  { %902 = vmatpush3.bf16.msra.mxu0 %v1030_v17  ;;  %1014 = vmatpush3.bf16.msra.mxu1 %v1030_v17 }
  0x22   :  { %369 = vmatmul.mubr.bf16.vlgmr.msra.gmra.mrb[0].mxu0 %v1031_v18  ;;  %433 = vmatmul.mubr.bf16.vlgmr.msra.gmra.mrb[0].mxu1 %v1034_v19 }
  0x23   :  { %376 = vmatprep.mubr.bf16.mxu0 %v1037_v20  ;;  %440 = vmatprep.mubr.bf16.mxu1 %v1039_v21 }
  0x2a   :  { %377 = vmatmul.mubr.bf16.gmra.mrb[4].mxu0 %v1041_v22  ;;  %441 = vmatmul.mubr.bf16.gmra.mrb[4].mxu1 %v1042_v23 }
  0x2b   :  { %384 = vmatprep.mubr.bf16.mxu0 %v1043_v24  ;;  %448 = vmatprep.mubr.bf16.mxu1 %v1045_v25 }
  0x32   :  { %385 = vmatmul.mubr.bf16.gmra.mrb[8].mxu0 %v1047_v26  ;;  %449 = vmatmul.mubr.bf16.gmra.mrb[8].mxu1 %v1048_v27 }
  0x33   :  { %392 = vmatprep.mubr.bf16.mxu0 %v1049_v28  ;;  %456 = vmatprep.mubr.bf16.mxu1 %v1051_v29 }
  0x3a   :  { %393 = vmatmul.mubr.bf16.gmra.mrb[12].mxu0 %v1053_v30  ;;  %457 = vmatmul.mubr.bf16.gmra.mrb[12].mxu1 %v1054_v31 }
  0x3b   :  { %400 = vmatprep.mubr.bf16.mxu0 %v1055_v32  ;;  %464 = vmatprep.mubr.bf16.mxu1 %v1057_v33 }
  0x42   :  { %401 = vmatmul.mubr.bf16.gmra.mrb[16].mxu0 %v1059_v34  ;;  %465 = vmatmul.mubr.bf16.gmra.mrb[16].mxu1 %v1060_v35 }
  0x43   :  { %408 = vmatprep.mubr.bf16.mxu0 %v1061_v36  ;;  %472 = vmatprep.mubr.bf16.mxu1 %v1063_v37 }
  0x4a   :  { %409 = vmatmul.mubr.bf16.gmra.mrb[20].mxu0 %v1065_v38  ;;  %473 = vmatmul.mubr.bf16.gmra.mrb[20].mxu1 %v1066_v39 }
  0x4b   :  { %416 = vmatprep.mubr.bf16.mxu0 %v1067_v40  ;;  %480 = vmatprep.mubr.bf16.mxu1 %v1069_v41 }
  0x52   :  { %417 = vmatmul.mubr.bf16.gmra.mrb[24].mxu0 %v1071_v43  ;;  %481 = vmatmul.mubr.bf16.gmra.mrb[24].mxu1 %v1072_v44 }
  0x53   :  { %424 = vmatprep.mubr.bf16.mxu0 %v1073_v45  ;;  %488 = vmatprep.mubr.bf16.mxu1 %v719_v46 }
  0x5a   :  { %425 = vmatmul.mubr.bf16.gmra.mrb[28].mxu0 %v1076_v47  ;;  %489 = vmatmul.mubr.bf16.gmra.mrb[28].mxu1 %v718_v48 }
  0xf5   :  { %v903_v49 = vpop.f32.mrb[0].mxu0  ;;  %v951_v50 = vpop.f32.mrb[0].mxu1 }
  0xf6   :  { %v904_v52 = vpop.f32.mrb[1].mxu0  ;;  %v952_v53 = vpop.f32.mrb[1].mxu1 }
  0xf7   :  { %v905_v54 = vadd.f32 %v904_v52, %v903_v49  ;;  %v953_v55 = vadd.f32 %v952_v53, %v951_v50  ;;  %v906_v56 = vpop.f32.mrb[2].mxu0  ;;  %v954_v57 = vpop.f32.mrb[2].mxu1 }
  0xf8   :  { %v907_v58 = vpop.f32.mrb[3].mxu0  ;;  %v955_v59 = vpop.f32.mrb[3].mxu1 }
  0xf9   :  { %v371_v60 = vadd.f32 %v905_v54, %v1242_v51  ;;  %v435_v61 = vadd.f32 %v953_v55, %v1242_v51  ;;  %v908_v62 = vadd.f32 %v907_v58, %v906_v56  ;;  %v956_v63 = vadd.f32 %v955_v59, %v954_v57 }
  0xfb   :  { %v512_v0 = vmax.f32 %v435_v61, 0.0  ;;  %v374_v1 = vadd.f32 %v908_v62, %v1242_v51  ;;  %v438_v2 = vadd.f32 %v956_v63, %v1242_v51  ;;  %v496_v3 = vmax.f32 %v371_v60, 0.0 }
  0xfd   :  { %v497_v4 = vmax.f32 %v374_v1, 0.0  ;;  %v513_v5 = vmax.f32 %v438_v2, 0.0  ;;  %v909_v6 = vpop.f32.mrb[4].mxu0  ;;  %v957_v7 = vpop.f32.mrb[4].mxu1 }
  0xfe   :  { %v910_v8 = vpop.f32.mrb[5].mxu0  ;;  %v958_v9 = vpop.f32.mrb[5].mxu1 }
  0xff   :  { %v801_v10 = vpack.c.bf16 %v497_v4, %v496_v3  ;;  %v841_v11 = vpack.c.bf16 %v513_v5, %v512_v0  ;;  %v911_v12 = vadd.f32 %v910_v8, %v909_v6  ;;  %v959_v13 = vadd.f32 %v958_v9, %v957_v7  ;;  %v912_v14 = vpop.f32.mrb[6].mxu0  ;;  %v960_v15 = vpop.f32.mrb[6].mxu1 }
 0x100   :  { %v913_v16 = vpop.f32.mrb[7].mxu0  ;;  %v961_v17 = vpop.f32.mrb[7].mxu1 }
 0x101   :  { %802 = vst [vmem:[%s1326_s3] sm:$0xff] %v801_v10   ;;  %880 = vst [vmem:[%s1326_s3 + $0x40] sm:$0xff] %v841_v11   ;;  %v379_v18 = vadd.f32 %v911_v12, %v1242_v51  ;;  %v443_v19 = vadd.f32 %v959_v13, %v1242_v51  ;;  %v914_v20 = vadd.f32 %v913_v16, %v912_v14 }
 0x102   :  { %v962_v21 = vadd.f32 %v961_v17, %v960_v15 }
 0x103   :  { %v514_v22 = vmax.f32 %v443_v19, 0.0  ;;  %v382_v23 = vadd.f32 %v914_v20, %v1242_v51  ;;  %v498_v25 = vmax.f32 %v379_v18, 0.0 }
 0x104   :  { %v446_v24 = vadd.f32 %v962_v21, %v1242_v51 }
 0x105   :  { %v499_v26 = vmax.f32 %v382_v23, 0.0  ;;  %v915_v28 = vpop.f32.mrb[8].mxu0  ;;  %v963_v29 = vpop.f32.mrb[8].mxu1 }
 0x106   :  { %v515_v27 = vmax.f32 %v446_v24, 0.0  ;;  %v916_v30 = vpop.f32.mrb[9].mxu0  ;;  %v964_v31 = vpop.f32.mrb[9].mxu1 }
 0x107   :  { %v806_v32 = vpack.c.bf16 %v499_v26, %v498_v25  ;;  %v917_v34 = vadd.f32 %v916_v30, %v915_v28  ;;  %v965_v35 = vadd.f32 %v964_v31, %v963_v29  ;;  %v918_v36 = vpop.f32.mrb[10].mxu0  ;;  %v966_v37 = vpop.f32.mrb[10].mxu1 }
 0x108   :  { %v846_v33 = vpack.c.bf16 %v515_v27, %v514_v22  ;;  %v919_v38 = vpop.f32.mrb[11].mxu0  ;;  %v967_v39 = vpop.f32.mrb[11].mxu1 }
 0x109   :  { %873 = vst [vmem:[%s1326_s3 + $0x8] sm:$0xff] %v806_v32   ;;  %v387_v40 = vadd.f32 %v917_v34, %v1242_v51  ;;  %v451_v41 = vadd.f32 %v965_v35, %v1242_v51  ;;  %v920_v42 = vadd.f32 %v919_v38, %v918_v36  ;;  %v968_v43 = vadd.f32 %v967_v39, %v966_v37 }
 0x10a   :  { %881 = vst [vmem:[%s1326_s3 + $0x48] sm:$0xff] %v846_v33  }
 0x10b   :  { %v516_v44 = vmax.f32 %v451_v41, 0.0  ;;  %v390_v45 = vadd.f32 %v920_v42, %v1242_v51  ;;  %v454_v46 = vadd.f32 %v968_v43, %v1242_v51  ;;  %v500_v47 = vmax.f32 %v387_v40, 0.0 }
 0x10d   :  { %v501_v48 = vmax.f32 %v390_v45, 0.0  ;;  %v517_v49 = vmax.f32 %v454_v46, 0.0  ;;  %v921_v50 = vpop.f32.mrb[12].mxu0  ;;  %v969_v52 = vpop.f32.mrb[12].mxu1 }
 0x10e   :  { %v922_v53 = vpop.f32.mrb[13].mxu0  ;;  %v970_v54 = vpop.f32.mrb[13].mxu1 }
 0x10f   :  { %v811_v55 = vpack.c.bf16 %v501_v48, %v500_v47  ;;  %v851_v56 = vpack.c.bf16 %v517_v49, %v516_v44  ;;  %v923_v57 = vadd.f32 %v922_v53, %v921_v50  ;;  %v971_v58 = vadd.f32 %v970_v54, %v969_v52  ;;  %v924_v59 = vpop.f32.mrb[14].mxu0  ;;  %v972_v60 = vpop.f32.mrb[14].mxu1 }
 0x110   :  { %v925_v61 = vpop.f32.mrb[15].mxu0  ;;  %v973_v62 = vpop.f32.mrb[15].mxu1 }
 0x111   :  { %874 = vst [vmem:[%s1326_s3 + $0x10] sm:$0xff] %v811_v55   ;;  %882 = vst [vmem:[%s1326_s3 + $0x50] sm:$0xff] %v851_v56   ;;  %v395_v63 = vadd.f32 %v923_v57, %v1242_v51  ;;  %v459_v0 = vadd.f32 %v971_v58, %v1242_v51  ;;  %v926_v1 = vadd.f32 %v925_v61, %v924_v59 }
 0x112   :  { %v974_v2 = vadd.f32 %v973_v62, %v972_v60 }
 0x113   :  { %v518_v3 = vmax.f32 %v459_v0, 0.0  ;;  %v398_v4 = vadd.f32 %v926_v1, %v1242_v51  ;;  %v502_v6 = vmax.f32 %v395_v63, 0.0 }
 0x114   :  { %v462_v5 = vadd.f32 %v974_v2, %v1242_v51 }
 0x115   :  { %v503_v7 = vmax.f32 %v398_v4, 0.0  ;;  %v927_v9 = vpop.f32.mrb[16].mxu0  ;;  %v975_v10 = vpop.f32.mrb[16].mxu1 }
 0x116   :  { %v519_v8 = vmax.f32 %v462_v5, 0.0  ;;  %v928_v11 = vpop.f32.mrb[17].mxu0  ;;  %v976_v12 = vpop.f32.mrb[17].mxu1 }
 0x117   :  { %v816_v13 = vpack.c.bf16 %v503_v7, %v502_v6  ;;  %v929_v15 = vadd.f32 %v928_v11, %v927_v9  ;;  %v977_v16 = vadd.f32 %v976_v12, %v975_v10  ;;  %v930_v17 = vpop.f32.mrb[18].mxu0  ;;  %v978_v18 = vpop.f32.mrb[18].mxu1 }
 0x118   :  { %v856_v14 = vpack.c.bf16 %v519_v8, %v518_v3  ;;  %v931_v19 = vpop.f32.mrb[19].mxu0  ;;  %v979_v20 = vpop.f32.mrb[19].mxu1 }
 0x119   :  { %875 = vst [vmem:[%s1326_s3 + $0x18] sm:$0xff] %v816_v13   ;;  %v403_v21 = vadd.f32 %v929_v15, %v1242_v51  ;;  %v467_v22 = vadd.f32 %v977_v16, %v1242_v51  ;;  %v932_v23 = vadd.f32 %v931_v19, %v930_v17  ;;  %v980_v24 = vadd.f32 %v979_v20, %v978_v18 }
 0x11a   :  { %883 = vst [vmem:[%s1326_s3 + $0x58] sm:$0xff] %v856_v14  }
 0x11b   :  { %v520_v25 = vmax.f32 %v467_v22, 0.0  ;;  %v406_v26 = vadd.f32 %v932_v23, %v1242_v51  ;;  %v470_v27 = vadd.f32 %v980_v24, %v1242_v51  ;;  %v504_v28 = vmax.f32 %v403_v21, 0.0 }
 0x11d   :  { %v505_v29 = vmax.f32 %v406_v26, 0.0  ;;  %v521_v30 = vmax.f32 %v470_v27, 0.0  ;;  %v933_v31 = vpop.f32.mrb[20].mxu0  ;;  %v981_v32 = vpop.f32.mrb[20].mxu1 }
 0x11e   :  { %v934_v33 = vpop.f32.mrb[21].mxu0  ;;  %v982_v34 = vpop.f32.mrb[21].mxu1 }
 0x11f   :  { %v821_v35 = vpack.c.bf16 %v505_v29, %v504_v28  ;;  %v861_v36 = vpack.c.bf16 %v521_v30, %v520_v25  ;;  %v935_v37 = vadd.f32 %v934_v33, %v933_v31  ;;  %v983_v38 = vadd.f32 %v982_v34, %v981_v32  ;;  %v936_v39 = vpop.f32.mrb[22].mxu0  ;;  %v984_v40 = vpop.f32.mrb[22].mxu1 }
 0x120   :  { %v937_v41 = vpop.f32.mrb[23].mxu0  ;;  %v985_v42 = vpop.f32.mrb[23].mxu1 }
 0x121   :  { %876 = vst [vmem:[%s1326_s3 + $0x20] sm:$0xff] %v821_v35   ;;  %884 = vst [vmem:[%s1326_s3 + $0x60] sm:$0xff] %v861_v36   ;;  %v411_v43 = vadd.f32 %v935_v37, %v1242_v51  ;;  %v475_v44 = vadd.f32 %v983_v38, %v1242_v51  ;;  %v938_v45 = vadd.f32 %v937_v41, %v936_v39 }
 0x122   :  { %v986_v46 = vadd.f32 %v985_v42, %v984_v40 }
 0x123   :  { %v522_v47 = vmax.f32 %v475_v44, 0.0  ;;  %v414_v48 = vadd.f32 %v938_v45, %v1242_v51  ;;  %v506_v50 = vmax.f32 %v411_v43, 0.0 }
 0x124   :  { %v478_v49 = vadd.f32 %v986_v46, %v1242_v51 }
 0x125   :  { %v507_v52 = vmax.f32 %v414_v48, 0.0  ;;  %v939_v54 = vpop.f32.mrb[24].mxu0  ;;  %v987_v55 = vpop.f32.mrb[24].mxu1 }
 0x126   :  { %v523_v53 = vmax.f32 %v478_v49, 0.0  ;;  %v940_v56 = vpop.f32.mrb[25].mxu0  ;;  %v988_v57 = vpop.f32.mrb[25].mxu1 }
 0x127   :  { %v826_v58 = vpack.c.bf16 %v507_v52, %v506_v50  ;;  %v941_v60 = vadd.f32 %v940_v56, %v939_v54  ;;  %v989_v61 = vadd.f32 %v988_v57, %v987_v55  ;;  %v942_v62 = vpop.f32.mrb[26].mxu0  ;;  %v990_v63 = vpop.f32.mrb[26].mxu1 }
 0x128   :  { %v866_v59 = vpack.c.bf16 %v523_v53, %v522_v47  ;;  %v943_v0 = vpop.f32.mrb[27].mxu0  ;;  %v991_v1 = vpop.f32.mrb[27].mxu1 }
 0x129   :  { %877 = vst [vmem:[%s1326_s3 + $0x28] sm:$0xff] %v826_v58   ;;  %v419_v2 = vadd.f32 %v941_v60, %v1242_v51  ;;  %v483_v3 = vadd.f32 %v989_v61, %v1242_v51  ;;  %v944_v4 = vadd.f32 %v943_v0, %v942_v62  ;;  %v992_v5 = vadd.f32 %v991_v1, %v990_v63 }
 0x12a   :  { %885 = vst [vmem:[%s1326_s3 + $0x68] sm:$0xff] %v866_v59  }
 0x12b   :  { %v524_v6 = vmax.f32 %v483_v3, 0.0  ;;  %v422_v7 = vadd.f32 %v944_v4, %v1242_v51  ;;  %v486_v8 = vadd.f32 %v992_v5, %v1242_v51  ;;  %v508_v9 = vmax.f32 %v419_v2, 0.0 }
 0x12d   :  { %v509_v10 = vmax.f32 %v422_v7, 0.0  ;;  %v525_v11 = vmax.f32 %v486_v8, 0.0  ;;  %v945_v12 = vpop.f32.mrb[28].mxu0  ;;  %v993_v13 = vpop.f32.mrb[28].mxu1 }
 0x12e   :  { %v946_v14 = vpop.f32.mrb[29].mxu0  ;;  %v994_v15 = vpop.f32.mrb[29].mxu1 }
 0x12f   :  { %v831_v16 = vpack.c.bf16 %v509_v10, %v508_v9  ;;  %v871_v17 = vpack.c.bf16 %v525_v11, %v524_v6  ;;  %v947_v18 = vadd.f32 %v946_v14, %v945_v12  ;;  %v995_v19 = vadd.f32 %v994_v15, %v993_v13  ;;  %v948_v20 = vpop.f32.mrb[30].mxu0  ;;  %v996_v21 = vpop.f32.mrb[30].mxu1 }
 0x130   :  { %v949_v22 = vpop.f32.mrb[31].mxu0  ;;  %v997_v23 = vpop.f32.mrb[31].mxu1 }
 0x131   :  { %878 = vst [vmem:[%s1326_s3 + $0x30] sm:$0xff] %v831_v16   ;;  %886 = vst [vmem:[%s1326_s3 + $0x70] sm:$0xff] %v871_v17   ;;  %v427_v24 = vadd.f32 %v947_v18, %v1242_v51  ;;  %v491_v25 = vadd.f32 %v995_v19, %v1242_v51  ;;  %v950_v26 = vadd.f32 %v949_v22, %v948_v20 }
 0x133   :  { %v526_v27 = vmax.f32 %v491_v25, 0.0  ;;  %v430_v28 = vadd.f32 %v950_v26, %v1242_v51  ;;  %v510_v29 = vmax.f32 %v427_v24, 0.0 }
 0x135   :  { %v797_v30 = vpack.c.bf16 %v526_v27, %v526_v27  ;;  %v511_v31 = vmax.f32 %v430_v28, 0.0 }
 0x137   :  { %682 = vst [vmem:[%s1326_s3 + $0x78] sm:$0xf] %v797_v30  ;;  %v836_v32 = vpack.c.bf16 %v511_v31, %v510_v29 }
 0x139   :  { %879 = vst [vmem:[%s1326_s3 + $0x38] sm:$0xff] %v836_v32  }

// kernel: net_dqn_forward.4
= control target key start
LH: loop header
LB: loop body
LE: loop exit
PB: predicated region body
PF: predicated region fallthrough
CT: control target
= control target key end

     0   :  { %s1397_s1 = inlined_call_operand.vmem [shape: bf16[1024,128], index: 1, kind: input, shape index: {}]   ;;  %s1398_s0 = inlined_call_operand.vmem [shape: bf16[32,1024], index: 0, kind: input, shape index: {}]   ;;  %s1399_s2 = inlined_call_operand.vmem [shape: f32[8,128], index: 2, kind: input, shape index: {}]   ;;  %s1400_s3 = inlined_call_operand.vmem [shape: bf16[32,128], index: 3, kind: output, shape index: {}]  }
   0x1   :  { %v1064_v0 = vld [vmem:[%s1397_s1 + $0x40] sm:$0xff]   ;;  %v1068_v4 = vld [vmem:[%s1397_s1 + $0x48] sm:$0xff]   ;;  %v1072_v8 = vld [vmem:[%s1397_s1 + $0x50] sm:$0xff]  }
   0x2   :  { %v1065_v1 = vld [vmem:[%s1397_s1 + $0xc0] sm:$0xff]   ;;  %952 = vmatprep.subr.bf16.mxu0 %v1064_v0  ;;  %v1069_v5 = vld [vmem:[%s1397_s1 + $0xc8] sm:$0xff]   ;;  %v1073_v9 = vld [vmem:[%s1397_s1 + $0xd0] sm:$0xff]  }
   0x3   :  { %v1066_v2 = vld [vmem:[%s1397_s1] sm:$0xff]   ;;  %980 = vmatprep.subr.bf16.mxu1 %v1065_v1  ;;  %v1070_v6 = vld [vmem:[%s1397_s1 + $0x8] sm:$0xff]   ;;  %v1074_v10 = vld [vmem:[%s1397_s1 + $0x10] sm:$0xff]  }
   0x4   :  { %v1067_v3 = vld [vmem:[%s1397_s1 + $0x80] sm:$0xff]   ;;  %953 = vmatpush3.bf16.msra.mxu0 %v1066_v2  ;;  %v1071_v7 = vld [vmem:[%s1397_s1 + $0x88] sm:$0xff]   ;;  %v1075_v11 = vld [vmem:[%s1397_s1 + $0x90] sm:$0xff]  }
   0x5   :  { %981 = vmatpush3.bf16.msra.mxu1 %v1067_v3  ;;  %954 = vmatprep.subr.bf16.mxu0 %v1068_v4  ;;  %v1076_v12 = vld [vmem:[%s1397_s1 + $0x58] sm:$0xff]   ;;  %v1080_v16 = vld [vmem:[%s1397_s1 + $0x60] sm:$0xff]   ;;  %v1084_v20 = vld [vmem:[%s1397_s1 + $0x68] sm:$0xff]  }
   0x6   :  { %982 = vmatprep.subr.bf16.mxu1 %v1069_v5  ;;  %v1077_v13 = vld [vmem:[%s1397_s1 + $0xd8] sm:$0xff]   ;;  %v1081_v17 = vld [vmem:[%s1397_s1 + $0xe0] sm:$0xff]   ;;  %v1085_v21 = vld [vmem:[%s1397_s1 + $0xe8] sm:$0xff]  }
   0x7   :  { %v1078_v14 = vld [vmem:[%s1397_s1 + $0x18] sm:$0xff]   ;;  %v1082_v18 = vld [vmem:[%s1397_s1 + $0x20] sm:$0xff]   ;;  %v1086_v22 = vld [vmem:[%s1397_s1 + $0x28] sm:$0xff]  }
   0x8   :  { %955 = vmatpush3.bf16.msra.mxu0 %v1070_v6  ;;  %v1079_v15 = vld [vmem:[%s1397_s1 + $0x98] sm:$0xff]   ;;  %v1083_v19 = vld [vmem:[%s1397_s1 + $0xa0] sm:$0xff]   ;;  %v1087_v23 = vld [vmem:[%s1397_s1 + $0xa8] sm:$0xff]  }
   0x9   :  { %983 = vmatpush3.bf16.msra.mxu1 %v1071_v7  ;;  %956 = vmatprep.subr.bf16.mxu0 %v1072_v8  ;;  %v1088_v24 = vld [vmem:[%s1397_s1 + $0x70] sm:$0xff]   ;;  %v1092_v28 = vld [vmem:[%s1397_s1 + $0x78] sm:$0xff]   ;;  %v15_v32 = vld [vmem:[%s1398_s0] sm:$0xff] }
   0xa   :  { %984 = vmatprep.subr.bf16.mxu1 %v1073_v9  ;;  %v1089_v25 = vld [vmem:[%s1397_s1 + $0xf0] sm:$0xff]   ;;  %v1093_v29 = vld [vmem:[%s1397_s1 + $0xf8] sm:$0xff]   ;;  %v19_v33 = vld [vmem:[%s1398_s0 + $0x20] sm:$0xff] }
   0xb   :  { %v1090_v26 = vld [vmem:[%s1397_s1 + $0x30] sm:$0xff]   ;;  %v1094_v30 = vld [vmem:[%s1397_s1 + $0x38] sm:$0xff]   ;;  %v16_v34 = vld [vmem:[%s1398_s0 + $0x8] sm:$0xff]  ;;  %v853_v35 = vcombine.low %v15_v32, %v19_v33  ;;  %v854_v36 = vcombine.high %v15_v32, %v19_v33 }
   0xc   :  { %957 = vmatpush3.bf16.msra.mxu0 %v1074_v10  ;;  %v1091_v27 = vld [vmem:[%s1397_s1 + $0xb0] sm:$0xff]   ;;  %v1095_v31 = vld [vmem:[%s1397_s1 + $0xb8] sm:$0xff]   ;;  %v20_v37 = vld [vmem:[%s1398_s0 + $0x28] sm:$0xff] }
   0xd   :  { %985 = vmatpush3.bf16.msra.mxu1 %v1075_v11  ;;  %958 = vmatprep.subr.bf16.mxu0 %v1076_v12  ;;  %v855_v38 = vcombine.low %v16_v34, %v20_v37  ;;  %v856_v39 = vcombine.high %v16_v34, %v20_v37  ;;  %v1096_v40 = vld [vmem:[%s1397_s1 + $0x140] sm:$0xff]   ;;  %v1100_v44 = vld [vmem:[%s1397_s1 + $0x148] sm:$0xff]   ;;  %v1104_v48 = vld [vmem:[%s1397_s1 + $0x150] sm:$0xff]  }
   0xe   :  { %986 = vmatprep.subr.bf16.mxu1 %v1077_v13  ;;  %660 = vmatprep.mubr.bf16.mxu0 %v854_v36  ;;  %v1097_v41 = vld [vmem:[%s1397_s1 + $0x1c0] sm:$0xff]   ;;  %v1101_v45 = vld [vmem:[%s1397_s1 + $0x1c8] sm:$0xff]   ;;  %v1105_v49 = vld [vmem:[%s1397_s1 + $0x1d0] sm:$0xff]  }
   0xf   :  { %709 = vmatprep.mubr.bf16.mxu1 %v856_v39  ;;  %v1098_v42 = vld [vmem:[%s1397_s1 + $0x100] sm:$0xff]   ;;  %v1102_v46 = vld [vmem:[%s1397_s1 + $0x108] sm:$0xff]   ;;  %v1106_v50 = vld [vmem:[%s1397_s1 + $0x110] sm:$0xff]  }
  0x10   :  { %959 = vmatpush3.bf16.msra.mxu0 %v1078_v14  ;;  %v1099_v43 = vld [vmem:[%s1397_s1 + $0x180] sm:$0xff]   ;;  %v1103_v47 = vld [vmem:[%s1397_s1 + $0x188] sm:$0xff]   ;;  %v1107_v51 = vld [vmem:[%s1397_s1 + $0x190] sm:$0xff]  }
  0x11   :  { %987 = vmatpush3.bf16.msra.mxu1 %v1079_v15  ;;  %960 = vmatprep.subr.bf16.mxu0 %v1080_v16  ;;  %v1108_v52 = vld [vmem:[%s1397_s1 + $0x158] sm:$0xff]   ;;  %v1112_v56 = vld [vmem:[%s1397_s1 + $0x160] sm:$0xff]   ;;  %v1116_v63 = vld [vmem:[%s1397_s1 + $0x168] sm:$0xff]  }
  0x12   :  { %988 = vmatprep.subr.bf16.mxu1 %v1081_v17  ;;  %v1109_v53 = vld [vmem:[%s1397_s1 + $0x1d8] sm:$0xff]   ;;  %v1113_v57 = vld [vmem:[%s1397_s1 + $0x1e0] sm:$0xff]   ;;  %v1117_v1 = vld [vmem:[%s1397_s1 + $0x1e8] sm:$0xff]  }
  0x13   :  { %v1110_v54 = vld [vmem:[%s1397_s1 + $0x118] sm:$0xff]   ;;  %v1114_v58 = vld [vmem:[%s1397_s1 + $0x120] sm:$0xff]   ;;  %v1118_v2 = vld [vmem:[%s1397_s1 + $0x128] sm:$0xff]  }
  0x14   :  { %961 = vmatpush3.bf16.msra.mxu0 %v1082_v18  ;;  %v1111_v55 = vld [vmem:[%s1397_s1 + $0x198] sm:$0xff]   ;;  %v1115_v59 = vld [vmem:[%s1397_s1 + $0x1a0] sm:$0xff]   ;;  %v1119_v3 = vld [vmem:[%s1397_s1 + $0x1a8] sm:$0xff]  }
  0x15   :  { %989 = vmatpush3.bf16.msra.mxu1 %v1083_v19  ;;  %962 = vmatprep.subr.bf16.mxu0 %v1084_v20  ;;  %v23_v60 = vld [vmem:[%s1398_s0 + $0x40] sm:$0xff]  ;;  %v24_v4 = vld [vmem:[%s1398_s0 + $0x48] sm:$0xff]  ;;  %v1120_v8 = vld [vmem:[%s1397_s1 + $0x170] sm:$0xff]  }
  0x16   :  { %990 = vmatprep.subr.bf16.mxu1 %v1085_v21  ;;  %v27_v61 = vld [vmem:[%s1398_s0 + $0x60] sm:$0xff]  ;;  %v28_v5 = vld [vmem:[%s1398_s0 + $0x68] sm:$0xff]  ;;  %v1121_v9 = vld [vmem:[%s1397_s1 + $0x1f0] sm:$0xff]  }
  0x17   :  { %v862_v62 = vcombine.high %v23_v60, %v27_v61  ;;  %v861_v0 = vcombine.low %v23_v60, %v27_v61  ;;  %v864_v6 = vcombine.high %v24_v4, %v28_v5  ;;  %v863_v7 = vcombine.low %v24_v4, %v28_v5  ;;  %v1122_v10 = vld [vmem:[%s1397_s1 + $0x130] sm:$0xff]   ;;  %v1124_v12 = vld [vmem:[%s1397_s1 + $0x178] sm:$0xff]   ;;  %v852_v34 = vld [vmem:[%s1399_s2] ss:$0 sm:$0xff] }
  0x18   :  { %963 = vmatpush3.bf16.msra.mxu0 %v1086_v22  ;;  %v1123_v11 = vld [vmem:[%s1397_s1 + $0x1b0] sm:$0xff]   ;;  %v1125_v13 = vld [vmem:[%s1397_s1 + $0x1f8] sm:$0xff]  }
  0x19   :  { %991 = vmatpush3.bf16.msra.mxu1 %v1087_v23  ;;  %964 = vmatprep.subr.bf16.mxu0 %v1088_v24  ;;  %v1126_v14 = vld [vmem:[%s1397_s1 + $0x138] sm:$0xff]   ;;  %v17_v16 = vld [vmem:[%s1398_s0 + $0x10] sm:$0xff] }
  0x1a   :  { %992 = vmatprep.subr.bf16.mxu1 %v1089_v25  ;;  %v1127_v15 = vld [vmem:[%s1397_s1 + $0x1b8] sm:$0xff]   ;;  %v21_v17 = vld [vmem:[%s1398_s0 + $0x30] sm:$0xff] }
  0x1b   :  { %v18_v18 = vld [vmem:[%s1398_s0 + $0x18] sm:$0xff]  ;;  %v857_v20 = vcombine.low %v17_v16, %v21_v17  ;;  %v858_v21 = vcombine.high %v17_v16, %v21_v17  ;;  %v25_v24 = vld [vmem:[%s1398_s0 + $0x50] sm:$0xff] }
  0x1c   :  { %965 = vmatpush3.bf16.msra.mxu0 %v1090_v26  ;;  %v22_v19 = vld [vmem:[%s1398_s0 + $0x38] sm:$0xff]  ;;  %v29_v25 = vld [vmem:[%s1398_s0 + $0x70] sm:$0xff] }
  0x1d   :  { %993 = vmatpush3.bf16.msra.mxu1 %v1091_v27  ;;  %966 = vmatprep.subr.bf16.mxu0 %v1092_v28  ;;  %v859_v22 = vcombine.low %v18_v18, %v22_v19  ;;  %v860_v23 = vcombine.high %v18_v18, %v22_v19  ;;  %v26_v26 = vld [vmem:[%s1398_s0 + $0x58] sm:$0xff]  ;;  %v866_v27 = vcombine.high %v25_v24, %v29_v25 }
  0x1e   :  { %994 = vmatprep.subr.bf16.mxu1 %v1093_v29  ;;  %v30_v28 = vld [vmem:[%s1398_s0 + $0x78] sm:$0xff] }
  0x1f   :  { %v868_v29 = vcombine.high %v26_v26, %v30_v28 }
  0x20   :  { %967 = vmatpush3.bf16.msra.mxu0 %v1094_v30  ;;  %v865_v30 = vcombine.low %v25_v24, %v29_v25 }
  0x21   :  { %995 = vmatpush3.bf16.msra.mxu1 %v1095_v31  ;;  %1008 = vmatprep.subr.bf16.mxu0 %v1096_v40  ;;  %v867_v31 = vcombine.low %v26_v26, %v30_v28 }
  0x22   :  { %1036 = vmatprep.subr.bf16.mxu1 %v1097_v41 }
  0x23   :  { %661 = vmatmul.mubr.bf16.vlgmr.msra.gmra.mrb[0].mxu0 %v853_v35 }
  0x24   :  { %710 = vmatmul.mubr.bf16.vlgmr.msra.gmra.mrb[0].mxu1 %v855_v38  ;;  %1009 = vmatpush3.bf16.msra.mxu0 %v1098_v42 }
  0x25   :  { %1037 = vmatpush3.bf16.msra.mxu1 %v1099_v43  ;;  %1010 = vmatprep.subr.bf16.mxu0 %v1100_v44 }
  0x26   :  { %1038 = vmatprep.subr.bf16.mxu1 %v1101_v45  ;;  %668 = vmatprep.mubr.bf16.mxu0 %v862_v62 }
  0x27   :  { %717 = vmatprep.mubr.bf16.mxu1 %v864_v6 }
  0x28   :  { %1011 = vmatpush3.bf16.msra.mxu0 %v1102_v46 }
  0x29   :  { %1039 = vmatpush3.bf16.msra.mxu1 %v1103_v47  ;;  %1012 = vmatprep.subr.bf16.mxu0 %v1104_v48 }
  0x2a   :  { %1040 = vmatprep.subr.bf16.mxu1 %v1105_v49 }
  0x2b   :  { %669 = vmatmul.mubr.bf16.gmra.mrb[4].mxu0 %v861_v0 }
  0x2c   :  { %1013 = vmatpush3.bf16.msra.mxu0 %v1106_v50  ;;  %718 = vmatmul.mubr.bf16.gmra.mrb[4].mxu1 %v863_v7 }
  0x2d   :  { %1041 = vmatpush3.bf16.msra.mxu1 %v1107_v51  ;;  %1014 = vmatprep.subr.bf16.mxu0 %v1108_v52 }
  0x2e   :  { %1042 = vmatprep.subr.bf16.mxu1 %v1109_v53  ;;  %758 = vmatprep.mubr.bf16.mxu0 %v858_v21 }
  0x2f   :  { %807 = vmatprep.mubr.bf16.mxu1 %v860_v23 }
  0x30   :  { %1015 = vmatpush3.bf16.msra.mxu0 %v1110_v54 }
  0x31   :  { %1043 = vmatpush3.bf16.msra.mxu1 %v1111_v55  ;;  %1016 = vmatprep.subr.bf16.mxu0 %v1112_v56 }
  0x32   :  { %1044 = vmatprep.subr.bf16.mxu1 %v1113_v57 }
  0x34   :  { %1017 = vmatpush3.bf16.msra.mxu0 %v1114_v58 }
  0x35   :  { %1045 = vmatpush3.bf16.msra.mxu1 %v1115_v59  ;;  %1018 = vmatprep.subr.bf16.mxu0 %v1116_v63 }
  0x36   :  { %1046 = vmatprep.subr.bf16.mxu1 %v1117_v1 }
  0x38   :  { %1019 = vmatpush3.bf16.msra.mxu0 %v1118_v2 }
  0x39   :  { %1047 = vmatpush3.bf16.msra.mxu1 %v1119_v3  ;;  %1020 = vmatprep.subr.bf16.mxu0 %v1120_v8 }
  0x3a   :  { %1048 = vmatprep.subr.bf16.mxu1 %v1121_v9 }
  0x3c   :  { %1021 = vmatpush3.bf16.msra.mxu0 %v1122_v10 }
  0x3d   :  { %1049 = vmatpush3.bf16.msra.mxu1 %v1123_v11  ;;  %1022 = vmatprep.subr.bf16.mxu0 %v1124_v12 }
  0x3e   :  { %1050 = vmatprep.subr.bf16.mxu1 %v1125_v13 }
  0x40   :  { %1023 = vmatpush3.bf16.msra.mxu0 %v1126_v14 }
  0x41   :  { %1051 = vmatpush3.bf16.msra.mxu1 %v1127_v15 }
  0x43   :  { %759 = vmatmul.mubr.bf16.vlgmr.msra.gmra.mrb[8].mxu0 %v857_v20 }
  0x44   :  { %808 = vmatmul.mubr.bf16.vlgmr.msra.gmra.mrb[8].mxu1 %v859_v22  ;;  %766 = vmatprep.mubr.bf16.mxu0 %v866_v27 }
  0x45   :  { %815 = vmatprep.mubr.bf16.mxu1 %v868_v29 }
  0x4b   :  { %767 = vmatmul.mubr.bf16.gmra.mrb[12].mxu0 %v865_v30 }
  0x4c   :  { %816 = vmatmul.mubr.bf16.gmra.mrb[12].mxu1 %v867_v31 }
  0xf6   :  { %v968_v32 = vpop.f32.mrb[0].mxu0 }
  0xf7   :  { %v996_v33 = vpop.f32.mrb[0].mxu1  ;;  %v969_v35 = vpop.f32.mrb[1].mxu0 }
  0xf8   :  { %v970_v36 = vadd.f32 %v969_v35, %v968_v32  ;;  %v997_v37 = vpop.f32.mrb[1].mxu1  ;;  %v971_v38 = vpop.f32.mrb[2].mxu0 }
  0xf9   :  { %v998_v39 = vadd.f32 %v997_v37, %v996_v33  ;;  %v999_v40 = vpop.f32.mrb[2].mxu1  ;;  %v972_v41 = vpop.f32.mrb[3].mxu0 }
  0xfa   :  { %v663_v42 = vadd.f32 %v970_v36, %v852_v34  ;;  %v973_v43 = vadd.f32 %v972_v41, %v971_v38  ;;  %v1000_v44 = vpop.f32.mrb[3].mxu1 }
  0xfb   :  { %v1001_v45 = vadd.f32 %v1000_v44, %v999_v40 }
  0xfc   :  { %v712_v46 = vadd.f32 %v998_v39, %v663_v42  ;;  %v666_v47 = vadd.f32 %v973_v43, %v852_v34 }
  0xfe   :  { %v715_v48 = vadd.f32 %v1001_v45, %v666_v47  ;;  %v974_v49 = vpop.f32.mrb[4].mxu0 }
  0xff   :  { %v975_v50 = vpop.f32.mrb[5].mxu0  ;;  %v1002_v56 = vpop.f32.mrb[4].mxu1 }
 0x100   :  { %v976_v51 = vadd.f32 %v975_v50, %v974_v49  ;;  %v977_v52 = vpop.f32.mrb[6].mxu0  ;;  %v1003_v57 = vpop.f32.mrb[5].mxu1 }
 0x101   :  { %v978_v53 = vpop.f32.mrb[7].mxu0  ;;  %v1004_v59 = vadd.f32 %v1003_v57, %v1002_v56  ;;  %v1005_v60 = vpop.f32.mrb[6].mxu1 }
 0x102   :  { %v979_v54 = vadd.f32 %v978_v53, %v977_v52  ;;  %v671_v55 = vadd.f32 %v976_v51, %v852_v34  ;;  %v1006_v61 = vpop.f32.mrb[7].mxu1 }
 0x103   :  { %v1007_v63 = vadd.f32 %v1006_v61, %v1005_v60 }
 0x104   :  { %v674_v58 = vadd.f32 %v979_v54, %v852_v34  ;;  %v720_v62 = vadd.f32 %v1004_v59, %v671_v55 }
 0x106   :  { %v723_v0 = vadd.f32 %v1007_v63, %v674_v58 }
 0x116   :  { %v1024_v1 = vpop.f32.mrb[8].mxu0 }
 0x117   :  { %v1052_v2 = vpop.f32.mrb[8].mxu1  ;;  %v1025_v3 = vpop.f32.mrb[9].mxu0 }
 0x118   :  { %v1053_v4 = vpop.f32.mrb[9].mxu1  ;;  %v1026_v5 = vadd.f32 %v1025_v3, %v1024_v1  ;;  %v1027_v7 = vpop.f32.mrb[10].mxu0 }
 0x119   :  { %v1054_v6 = vadd.f32 %v1053_v4, %v1052_v2  ;;  %v1055_v8 = vpop.f32.mrb[10].mxu1  ;;  %v1028_v9 = vpop.f32.mrb[11].mxu0 }
 0x11a   :  { %v1056_v10 = vpop.f32.mrb[11].mxu1  ;;  %v761_v11 = vadd.f32 %v1026_v5, %v712_v46  ;;  %v1029_v12 = vadd.f32 %v1028_v9, %v1027_v7 }
 0x11b   :  { %v1057_v13 = vadd.f32 %v1056_v10, %v1055_v8 }
 0x11c   :  { %v810_v14 = vadd.f32 %v1054_v6, %v761_v11  ;;  %v764_v15 = vadd.f32 %v1029_v12, %v715_v48 }
 0x11e   :  { %v813_v16 = vadd.f32 %v1057_v13, %v764_v15  ;;  %v1030_v17 = vpop.f32.mrb[12].mxu0  ;;  %v824_v21 = vmax.f32 %v810_v14, 0.0 }
 0x11f   :  { %v1058_v18 = vpop.f32.mrb[12].mxu1  ;;  %v1031_v19 = vpop.f32.mrb[13].mxu0 }
 0x120   :  { %v1059_v20 = vpop.f32.mrb[13].mxu1  ;;  %v825_v22 = vmax.f32 %v813_v16, 0.0  ;;  %v1032_v23 = vadd.f32 %v1031_v19, %v1030_v17  ;;  %v1033_v25 = vpop.f32.mrb[14].mxu0 }
 0x121   :  { %v1060_v24 = vadd.f32 %v1059_v20, %v1058_v18  ;;  %v1061_v26 = vpop.f32.mrb[14].mxu1  ;;  %v1034_v27 = vpop.f32.mrb[15].mxu0 }
 0x122   :  { %v1062_v28 = vpop.f32.mrb[15].mxu1  ;;  %v944_v29 = vpack.c.bf16 %v825_v22, %v824_v21  ;;  %v769_v30 = vadd.f32 %v1032_v23, %v720_v62  ;;  %v1035_v31 = vadd.f32 %v1034_v27, %v1033_v25 }
 0x123   :  { %v1063_v32 = vadd.f32 %v1062_v28, %v1061_v26 }
 0x124   :  { %945 = vst [vmem:[%s1400_s3] sm:$0xff] %v944_v29   ;;  %v818_v33 = vadd.f32 %v1060_v24, %v769_v30  ;;  %v772_v34 = vadd.f32 %v1035_v31, %v723_v0 }
 0x126   :  { %v821_v35 = vadd.f32 %v1063_v32, %v772_v34  ;;  %v826_v36 = vmax.f32 %v818_v33, 0.0 }
 0x128   :  { %v827_v37 = vmax.f32 %v821_v35, 0.0 }
 0x12a   :  { %v949_v38 = vpack.c.bf16 %v827_v37, %v826_v36 }
 0x12c   :  { %951 = vst [vmem:[%s1400_s3 + $0x8] sm:$0xff] %v949_v38  }

// kernel: net_dqn_forward.5
= control target key start
LH: loop header
LB: loop body
LE: loop exit
PB: predicated region body
PF: predicated region fallthrough
CT: control target
= control target key end

     0   :  { %s3274_s24 = smov 0   ;;  %s3939_s0 = inlined_call_operand.vmem [shape: bf16[8,2048], index: 0, kind: input, shape index: {}]   ;;  %s3940_s1 = inlined_call_operand.vmem [shape: bf16[2048,256], index: 1, kind: input, shape index: {}]   ;;  %s3941_s2 = inlined_call_operand.vmem [shape: f32[8,256], index: 2, kind: input, shape index: {}]   ;;  %s3942_s3 = inlined_call_operand.vmem [shape: bf16[256,256], index: 3, kind: input, shape index: {}]   ;;  %s3943_s4 = inlined_call_operand.vmem [shape: f32[8,256], index: 4, kind: input, shape index: {}]   ;;  %s3944_s5 = inlined_call_operand.vmem [shape: bf16[256,896], index: 5, kind: input, shape index: {}]   ;;  %s3945_s6 = inlined_call_operand.vmem [shape: f32[8,896], index: 6, kind: input, shape index: {}]   ;;  %s3946_s7 = inlined_call_operand.vmem [shape: f32[8,896], index: 7, kind: output, shape index: {}]  }
   0x1 LB: > { %s3280_s25 = sadd.s32 4294967295, %s3231_s24   ;;  %p2495_p0 = scmp.ge.s32.totalorder %s3231_s24, 1  ;;  %s3231_s24 = sphi %s3274_s24, %s17_s24  }
   0x2   : > { %p245_p1 = scmp.lt.s32.totalorder %s3231_s24, 3 }
   0x4   : > { %p246_p2 = pnand %p2495_p0, %p245_p1 }
   0x5   : > { %s2496_s26 = sshll.u32 (!%p246_p2), %s3280_s25, 3  ;;  %s2498_s27 = sshll.u32 (!%p246_p2), %s3280_s25, 7 }
   0x6   : > { %249 = sbr.rel (%p246_p2) target bundleno = 885 (0x375), region = 48  ;;  %p279_p3 = scmp.lt.s32.totalorder (!%p246_p2), %s2496_s26, 15 }
   0x7   : > { %p285_p4 = scmp.lt.s32.totalorder (!%p246_p2), %s2498_s27, 255  ;;  %p2501_p5 = scmp.ne.s32.totalorder (!%p246_p2), %s3280_s25, 0 }
   0xd   : > { %s3948_s26 = smov (!%p279_p3, %s2496_s26), 15  ;;  %s3950_s27 = smov (!%p285_p4, %s2498_s27), 255 }
   0xe   : > { %s2497_s28 = sshll.u32 %s3948_s26, 2  ;;  %s2785_s9 = sshll.u32 %s3950_s27, 3  ;;  %v3233_v0 = vmov (!%p2501_p5), 0.0  }
   0xf   : > { %s3289_s8 = scalar_lea.vmem %s3939_s0, %s2497_s28  ;;  %s3294_s12 = scalar_lea.vmem %s3940_s1, %s2785_s9  ;;  %296 = vst [vmem:[#allocation2] sm:$0xff] (!%p2501_p5), %v3233_v0  ;;  %297 = vst [vmem:[#allocation2 + $0x8] sm:$0xff] (!%p2501_p5), %v3233_v0 }
  0x10   : > { %295 = sbr.rel (%p2501_p5) target bundleno = 23 (0x17), region = 52 }
  0x17 PF: > { %v2817_v1 = vld [vmem:[%s3294_s12 + $0x4] ss:$8 sps:$4 sm:$0xff]   ;;  %v2821_v3 = vld [vmem:[%s3294_s12] ss:$8 sps:$4 sm:$0xff]   ;;  %v2823_v5 = vld [vmem:[%s3294_s12 + $0x14] ss:$8 sps:$4 sm:$0xff]  }
  0x18   : > { %v2819_v2 = vld [vmem:[%s3294_s12 + $0x104] ss:$8 sps:$4 sm:$0xff]   ;;  %1100 = vmatprep.subr.bf16.mxu0 %v2817_v1  ;;  %v2822_v4 = vld [vmem:[%s3294_s12 + $0x100] ss:$8 sps:$4 sm:$0xff]   ;;  %v2825_v6 = vld [vmem:[%s3294_s12 + $0x114] ss:$8 sps:$4 sm:$0xff]  }
  0x19   : > { %1141 = vmatprep.subr.bf16.mxu1 %v2819_v2  ;;  %1101 = vmatpush1.bf16.msra.mxu0 %v2821_v3  ;;  %v2827_v7 = vld [vmem:[%s3294_s12 + $0x10] ss:$8 sps:$4 sm:$0xff]   ;;  %v2829_v9 = vld [vmem:[%s3294_s12 + $0x24] ss:$8 sps:$4 sm:$0xff]   ;;  %v2833_v11 = vld [vmem:[%s3294_s12 + $0x20] ss:$8 sps:$4 sm:$0xff]  }
  0x1a   : > { %1142 = vmatpush1.bf16.msra.mxu1 %v2822_v4  ;;  %1102 = vmatprep.subr.bf16.mxu0 %v2823_v5  ;;  %v2828_v8 = vld [vmem:[%s3294_s12 + $0x110] ss:$8 sps:$4 sm:$0xff]   ;;  %v2831_v10 = vld [vmem:[%s3294_s12 + $0x124] ss:$8 sps:$4 sm:$0xff]   ;;  %v2834_v12 = vld [vmem:[%s3294_s12 + $0x120] ss:$8 sps:$4 sm:$0xff]  }
  0x1b   : > { %1143 = vmatprep.subr.bf16.mxu1 %v2825_v6  ;;  %v2835_v13 = vld [vmem:[%s3294_s12 + $0x34] ss:$8 sps:$4 sm:$0xff]   ;;  %v2839_v15 = vld [vmem:[%s3294_s12 + $0x30] ss:$8 sps:$4 sm:$0xff]   ;;  %v2841_v17 = vld [vmem:[%s3294_s12 + $0x44] ss:$8 sps:$4 sm:$0xff]  }
  0x1c   : > { %v2837_v14 = vld [vmem:[%s3294_s12 + $0x134] ss:$8 sps:$4 sm:$0xff]   ;;  %v2840_v16 = vld [vmem:[%s3294_s12 + $0x130] ss:$8 sps:$4 sm:$0xff]   ;;  %v2843_v18 = vld [vmem:[%s3294_s12 + $0x144] ss:$8 sps:$4 sm:$0xff]  }
  0x1d   : > { %1103 = vmatpush1.bf16.msra.mxu0 %v2827_v7  ;;  %v2845_v19 = vld [vmem:[%s3294_s12 + $0x40] ss:$8 sps:$4 sm:$0xff]   ;;  %v2847_v21 = vld [vmem:[%s3294_s12 + $0x54] ss:$8 sps:$4 sm:$0xff]   ;;  %v2851_v23 = vld [vmem:[%s3294_s12 + $0x50] ss:$8 sps:$4 sm:$0xff]  }
  0x1e   : > { %1144 = vmatpush1.bf16.msra.mxu1 %v2828_v8  ;;  %1104 = vmatprep.subr.bf16.mxu0 %v2829_v9  ;;  %v2846_v20 = vld [vmem:[%s3294_s12 + $0x140] ss:$8 sps:$4 sm:$0xff]   ;;  %v2849_v22 = vld [vmem:[%s3294_s12 + $0x154] ss:$8 sps:$4 sm:$0xff]   ;;  %v2852_v24 = vld [vmem:[%s3294_s12 + $0x150] ss:$8 sps:$4 sm:$0xff]  }
  0x1f   : > { %1145 = vmatprep.subr.bf16.mxu1 %v2831_v10  ;;  %v2853_v25 = vld [vmem:[%s3294_s12 + $0x64] ss:$8 sps:$4 sm:$0xff]   ;;  %v2857_v27 = vld [vmem:[%s3294_s12 + $0x60] ss:$8 sps:$4 sm:$0xff]   ;;  %v2859_v29 = vld [vmem:[%s3294_s12 + $0x74] ss:$8 sps:$4 sm:$0xff]  }
  0x20   : > { %v2855_v26 = vld [vmem:[%s3294_s12 + $0x164] ss:$8 sps:$4 sm:$0xff]   ;;  %v2858_v28 = vld [vmem:[%s3294_s12 + $0x160] ss:$8 sps:$4 sm:$0xff]   ;;  %v2861_v30 = vld [vmem:[%s3294_s12 + $0x174] ss:$8 sps:$4 sm:$0xff]  }
  0x21   : > { %1105 = vmatpush1.bf16.msra.mxu0 %v2833_v11  ;;  %v2863_v31 = vld [vmem:[%s3294_s12 + $0x70] ss:$8 sps:$4 sm:$0xff]   ;;  %v2865_v33 = vld [vmem:[%s3294_s12 + $0x84] ss:$8 sps:$4 sm:$0xff]   ;;  %v2869_v35 = vld [vmem:[%s3294_s12 + $0x80] ss:$8 sps:$4 sm:$0xff]  }
  0x22   : > { %1146 = vmatpush1.bf16.msra.mxu1 %v2834_v12  ;;  %1106 = vmatprep.subr.bf16.mxu0 %v2835_v13  ;;  %v2864_v32 = vld [vmem:[%s3294_s12 + $0x170] ss:$8 sps:$4 sm:$0xff]   ;;  %v2867_v34 = vld [vmem:[%s3294_s12 + $0x184] ss:$8 sps:$4 sm:$0xff]   ;;  %v2870_v36 = vld [vmem:[%s3294_s12 + $0x180] ss:$8 sps:$4 sm:$0xff]  }
  0x23   : > { %1147 = vmatprep.subr.bf16.mxu1 %v2837_v14  ;;  %v2871_v37 = vld [vmem:[%s3294_s12 + $0x94] ss:$8 sps:$4 sm:$0xff]   ;;  %v2875_v39 = vld [vmem:[%s3294_s12 + $0x90] ss:$8 sps:$4 sm:$0xff]   ;;  %v2877_v41 = vld [vmem:[%s3294_s12 + $0xa4] ss:$8 sps:$4 sm:$0xff]  }
  0x24   : > { %v2873_v38 = vld [vmem:[%s3294_s12 + $0x194] ss:$8 sps:$4 sm:$0xff]   ;;  %v2876_v40 = vld [vmem:[%s3294_s12 + $0x190] ss:$8 sps:$4 sm:$0xff]   ;;  %v2879_v42 = vld [vmem:[%s3294_s12 + $0x1a4] ss:$8 sps:$4 sm:$0xff]  }
  0x25   : > { %1107 = vmatpush1.bf16.msra.mxu0 %v2839_v15  ;;  %v2881_v43 = vld [vmem:[%s3294_s12 + $0xa0] ss:$8 sps:$4 sm:$0xff]   ;;  %v2883_v45 = vld [vmem:[%s3294_s12 + $0xb4] ss:$8 sps:$4 sm:$0xff]   ;;  %v2887_v50 = vld [vmem:[%s3294_s12 + $0xb0] ss:$8 sps:$4 sm:$0xff]  }
  0x26   : > { %1148 = vmatpush1.bf16.msra.mxu1 %v2840_v16  ;;  %1108 = vmatprep.subr.bf16.mxu0 %v2841_v17  ;;  %v2882_v44 = vld [vmem:[%s3294_s12 + $0x1a0] ss:$8 sps:$4 sm:$0xff]   ;;  %v2885_v46 = vld [vmem:[%s3294_s12 + $0x1b4] ss:$8 sps:$4 sm:$0xff]   ;;  %v2888_v51 = vld [vmem:[%s3294_s12 + $0x1b0] ss:$8 sps:$4 sm:$0xff]  }
  0x27   : > { %1149 = vmatprep.subr.bf16.mxu1 %v2843_v18  ;;  %v300_v47 = vld [vmem:[%s3289_s8] sm:$0xff]  ;;  %v301_v49 = vld [vmem:[%s3289_s8 + $0x8] sm:$0xff]  ;;  %v2895_v57 = vld [vmem:[%s3294_s12 + $0xd4] ss:$8 sps:$4 sm:$0xff]   ;;  %p2638_p6 = scmp.ne.s32.totalorder %s3280_s25, 1 }
  0x28   : > { %v2503_v48 = vcombine.high %v300_v47, %v300_v47  ;;  %v2505_v52 = vcombine.high %v301_v49, %v301_v49  ;;  %v2889_v53 = vld [vmem:[%s3294_s12 + $0xc4] ss:$8 sps:$4 sm:$0xff]   ;;  %v2893_v55 = vld [vmem:[%s3294_s12 + $0xc0] ss:$8 sps:$4 sm:$0xff]   ;;  %v2897_v58 = vld [vmem:[%s3294_s12 + $0x1d4] ss:$8 sps:$4 sm:$0xff]   ;;  %v2502_v7 = vcombine.low %v300_v47, %v300_v47  ;;  %v2504_v8 = vcombine.low %v301_v49, %v301_v49 }
  0x29   : > { %1109 = vmatpush1.bf16.msra.mxu0 %v2845_v19  ;;  %v2891_v54 = vld [vmem:[%s3294_s12 + $0x1c4] ss:$8 sps:$4 sm:$0xff]   ;;  %v2894_v56 = vld [vmem:[%s3294_s12 + $0x1c0] ss:$8 sps:$4 sm:$0xff]   ;;  %v2899_v59 = vld [vmem:[%s3294_s12 + $0xd0] ss:$8 sps:$4 sm:$0xff]  }
  0x2a   : > { %1150 = vmatpush1.bf16.msra.mxu1 %v2846_v20  ;;  %1110 = vmatprep.subr.bf16.mxu0 %v2847_v21  ;;  %v2900_v60 = vld [vmem:[%s3294_s12 + $0x1d0] ss:$8 sps:$4 sm:$0xff]   ;;  %v2901_v61 = vld [vmem:[%s3294_s12 + $0xe4] ss:$8 sps:$4 sm:$0xff]   ;;  %v2905_v63 = vld [vmem:[%s3294_s12 + $0xe0] ss:$8 sps:$4 sm:$0xff]  }
  0x2b   : > { %1151 = vmatprep.subr.bf16.mxu1 %v2849_v22  ;;  %1132 = vmatprep.mubr.bf16.mxu0 %v2503_v48  ;;  %v2903_v62 = vld [vmem:[%s3294_s12 + $0x1e4] ss:$8 sps:$4 sm:$0xff]   ;;  %v2906_v0 = vld [vmem:[%s3294_s12 + $0x1e0] ss:$8 sps:$4 sm:$0xff]   ;;  %v2907_v1 = vld [vmem:[%s3294_s12 + $0xf4] ss:$8 sps:$4 sm:$0xff]  }
  0x2c   : > { %1173 = vmatprep.mubr.bf16.mxu1 %v2505_v52  ;;  %v2909_v2 = vld [vmem:[%s3294_s12 + $0x1f4] ss:$8 sps:$4 sm:$0xff]   ;;  %v2911_v3 = vld [vmem:[%s3294_s12 + $0xf0] ss:$8 sps:$4 sm:$0xff]   ;;  %v2919_v5 = vld [vmem:[%s3294_s12 + $0x204] ss:$8 sps:$4 sm:$0xff]  }
  0x2d   : > { %1111 = vmatpush1.bf16.msra.mxu0 %v2851_v23  ;;  %v2912_v4 = vld [vmem:[%s3294_s12 + $0x1f0] ss:$8 sps:$4 sm:$0xff]   ;;  %v2922_v6 = vld [vmem:[%s3294_s12 + $0x304] ss:$8 sps:$4 sm:$0xff]   ;;  %v2917_v9 = vld [vmem:[%s3294_s12 + $0x200] ss:$8 sps:$4 sm:$0xff]  }
  0x2e   : > { %1152 = vmatpush1.bf16.msra.mxu1 %v2852_v24  ;;  %1112 = vmatprep.subr.bf16.mxu0 %v2853_v25  ;;  %v2920_v10 = vld [vmem:[%s3294_s12 + $0x300] ss:$8 sps:$4 sm:$0xff]   ;;  %v2925_v11 = vld [vmem:[%s3294_s12 + $0x214] ss:$8 sps:$4 sm:$0xff]   ;;  %v2923_v13 = vld [vmem:[%s3294_s12 + $0x210] ss:$8 sps:$4 sm:$0xff]  }
  0x2f   : > { %1153 = vmatprep.subr.bf16.mxu1 %v2855_v26  ;;  %v2928_v12 = vld [vmem:[%s3294_s12 + $0x314] ss:$8 sps:$4 sm:$0xff]   ;;  %v2926_v14 = vld [vmem:[%s3294_s12 + $0x310] ss:$8 sps:$4 sm:$0xff]   ;;  %v2931_v15 = vld [vmem:[%s3294_s12 + $0x224] ss:$8 sps:$4 sm:$0xff]  }
  0x30   : > { %v2934_v16 = vld [vmem:[%s3294_s12 + $0x324] ss:$8 sps:$4 sm:$0xff]   ;;  %v2929_v17 = vld [vmem:[%s3294_s12 + $0x220] ss:$8 sps:$4 sm:$0xff]   ;;  %v2937_v19 = vld [vmem:[%s3294_s12 + $0x234] ss:$8 sps:$4 sm:$0xff]  }
  0x31   : > { %1113 = vmatpush1.bf16.msra.mxu0 %v2857_v27  ;;  %v2932_v18 = vld [vmem:[%s3294_s12 + $0x320] ss:$8 sps:$4 sm:$0xff]   ;;  %v2940_v20 = vld [vmem:[%s3294_s12 + $0x334] ss:$8 sps:$4 sm:$0xff]   ;;  %v2935_v21 = vld [vmem:[%s3294_s12 + $0x230] ss:$8 sps:$4 sm:$0xff]  }
  0x32   : > { %1154 = vmatpush1.bf16.msra.mxu1 %v2858_v28  ;;  %1114 = vmatprep.subr.bf16.mxu0 %v2859_v29  ;;  %v2938_v22 = vld [vmem:[%s3294_s12 + $0x330] ss:$8 sps:$4 sm:$0xff]   ;;  %v2943_v23 = vld [vmem:[%s3294_s12 + $0x244] ss:$8 sps:$4 sm:$0xff]   ;;  %v2941_v25 = vld [vmem:[%s3294_s12 + $0x240] ss:$8 sps:$4 sm:$0xff]  }
  0x33   : > { %1155 = vmatprep.subr.bf16.mxu1 %v2861_v30  ;;  %v2946_v24 = vld [vmem:[%s3294_s12 + $0x344] ss:$8 sps:$4 sm:$0xff]   ;;  %v2944_v26 = vld [vmem:[%s3294_s12 + $0x340] ss:$8 sps:$4 sm:$0xff]   ;;  %v2949_v27 = vld [vmem:[%s3294_s12 + $0x254] ss:$8 sps:$4 sm:$0xff]  }
  0x34   : > { %v2952_v28 = vld [vmem:[%s3294_s12 + $0x354] ss:$8 sps:$4 sm:$0xff]   ;;  %v2947_v29 = vld [vmem:[%s3294_s12 + $0x250] ss:$8 sps:$4 sm:$0xff]   ;;  %v2982_v52 = vld [vmem:[%s3294_s12 + $0x3a4] ss:$8 sps:$4 sm:$0xff]  }
  0x35   : > { %1115 = vmatpush1.bf16.msra.mxu0 %v2863_v31  ;;  %v2950_v30 = vld [vmem:[%s3294_s12 + $0x350] ss:$8 sps:$4 sm:$0xff]   ;;  %v2955_v31 = vld [vmem:[%s3294_s12 + $0x264] ss:$8 sps:$4 sm:$0xff]   ;;  %v2973_v47 = vld [vmem:[%s3294_s12 + $0x294] ss:$8 sps:$4 sm:$0xff]  }
  0x36   : > { %1156 = vmatpush1.bf16.msra.mxu1 %v2864_v32  ;;  %1116 = vmatprep.subr.bf16.mxu0 %v2865_v33  ;;  %v2958_v32 = vld [vmem:[%s3294_s12 + $0x364] ss:$8 sps:$4 sm:$0xff]   ;;  %v3390_v33 = vld [vmem:[%s3289_s8 + $0x10] sm:$0xff] }
  0x37   : > { %1157 = vmatprep.subr.bf16.mxu1 %v2867_v34  ;;  %v3393_v34 = vld [vmem:[%s3289_s8 + $0x18] sm:$0xff] }
  0x38   : > { %v2976_v48 = vld [vmem:[%s3294_s12 + $0x394] ss:$8 sps:$4 sm:$0xff]   ;;  %v2971_v49 = vld [vmem:[%s3294_s12 + $0x290] ss:$8 sps:$4 sm:$0xff]  }
  0x39   : > { %1117 = vmatpush1.bf16.msra.mxu0 %v2869_v35  ;;  %v2507_v35 = vcombine.high %v3390_v33, %v3390_v33 }
  0x3a   : > { %1158 = vmatpush1.bf16.msra.mxu1 %v2870_v36  ;;  %1118 = vmatprep.subr.bf16.mxu0 %v2871_v37  ;;  %v2509_v36 = vcombine.high %v3393_v34, %v3393_v34  ;;  %v2953_v37 = vld [vmem:[%s3294_s12 + $0x260] ss:$8 sps:$4 sm:$0xff]  }
  0x3b   : > { %1159 = vmatprep.subr.bf16.mxu1 %v2873_v38  ;;  %v2956_v38 = vld [vmem:[%s3294_s12 + $0x360] ss:$8 sps:$4 sm:$0xff]  }
  0x3d   : > { %1119 = vmatpush1.bf16.msra.mxu0 %v2875_v39  ;;  %v2961_v39 = vld [vmem:[%s3294_s12 + $0x274] ss:$8 sps:$4 sm:$0xff]  }
  0x3e   : > { %1160 = vmatpush1.bf16.msra.mxu1 %v2876_v40  ;;  %1120 = vmatprep.subr.bf16.mxu0 %v2877_v41  ;;  %v2964_v40 = vld [vmem:[%s3294_s12 + $0x374] ss:$8 sps:$4 sm:$0xff]   ;;  %v2959_v41 = vld [vmem:[%s3294_s12 + $0x270] ss:$8 sps:$4 sm:$0xff]  }
  0x3f   : > { %1161 = vmatprep.subr.bf16.mxu1 %v2879_v42  ;;  %v2962_v42 = vld [vmem:[%s3294_s12 + $0x370] ss:$8 sps:$4 sm:$0xff]  }
  0x41   : > { %1121 = vmatpush1.bf16.msra.mxu0 %v2881_v43  ;;  %v2967_v43 = vld [vmem:[%s3294_s12 + $0x284] ss:$8 sps:$4 sm:$0xff]  }
  0x42   : > { %1162 = vmatpush1.bf16.msra.mxu1 %v2882_v44  ;;  %1122 = vmatprep.subr.bf16.mxu0 %v2883_v45  ;;  %v2970_v44 = vld [vmem:[%s3294_s12 + $0x384] ss:$8 sps:$4 sm:$0xff]   ;;  %v2965_v45 = vld [vmem:[%s3294_s12 + $0x280] ss:$8 sps:$4 sm:$0xff]  }
  0x43   : > { %1163 = vmatprep.subr.bf16.mxu1 %v2885_v46  ;;  %v2968_v46 = vld [vmem:[%s3294_s12 + $0x380] ss:$8 sps:$4 sm:$0xff]  }
  0x45   : > { %1123 = vmatpush1.bf16.msra.mxu0 %v2887_v50  ;;  %v2974_v50 = vld [vmem:[%s3294_s12 + $0x390] ss:$8 sps:$4 sm:$0xff]  }
  0x46   : > { %1164 = vmatpush1.bf16.msra.mxu1 %v2888_v51  ;;  %1124 = vmatprep.subr.bf16.mxu0 %v2889_v53  ;;  %v2979_v51 = vld [vmem:[%s3294_s12 + $0x2a4] ss:$8 sps:$4 sm:$0xff]   ;;  %v2977_v53 = vld [vmem:[%s3294_s12 + $0x2a0] ss:$8 sps:$4 sm:$0xff]  }
  0x47   : > { %1165 = vmatprep.subr.bf16.mxu1 %v2891_v54  ;;  %v2980_v54 = vld [vmem:[%s3294_s12 + $0x3a0] ss:$8 sps:$4 sm:$0xff]  }
  0x49   : > { %1125 = vmatpush1.bf16.msra.mxu0 %v2893_v55  ;;  %v2985_v55 = vld [vmem:[%s3294_s12 + $0x2b4] ss:$8 sps:$4 sm:$0xff]  }
  0x4a   : > { %1166 = vmatpush1.bf16.msra.mxu1 %v2894_v56  ;;  %1126 = vmatprep.subr.bf16.mxu0 %v2895_v57  ;;  %v2988_v56 = vld [vmem:[%s3294_s12 + $0x3b4] ss:$8 sps:$4 sm:$0xff]   ;;  %v2983_v57 = vld [vmem:[%s3294_s12 + $0x2b0] ss:$8 sps:$4 sm:$0xff]  }
  0x4b   : > { %1167 = vmatprep.subr.bf16.mxu1 %v2897_v58  ;;  %v2986_v58 = vld [vmem:[%s3294_s12 + $0x3b0] ss:$8 sps:$4 sm:$0xff]  }
  0x4d   : > { %1127 = vmatpush1.bf16.msra.mxu0 %v2899_v59  ;;  %v2991_v59 = vld [vmem:[%s3294_s12 + $0x2c4] ss:$8 sps:$4 sm:$0xff]  }
  0x4e   : > { %1168 = vmatpush1.bf16.msra.mxu1 %v2900_v60  ;;  %1128 = vmatprep.subr.bf16.mxu0 %v2901_v61  ;;  %v2994_v60 = vld [vmem:[%s3294_s12 + $0x3c4] ss:$8 sps:$4 sm:$0xff]   ;;  %v2989_v61 = vld [vmem:[%s3294_s12 + $0x2c0] ss:$8 sps:$4 sm:$0xff]  }
  0x4f   : > { %1169 = vmatprep.subr.bf16.mxu1 %v2903_v62  ;;  %v2992_v62 = vld [vmem:[%s3294_s12 + $0x3c0] ss:$8 sps:$4 sm:$0xff]  }
  0x51   : > { %1129 = vmatpush1.bf16.msra.mxu0 %v2905_v63  ;;  %v2997_v63 = vld [vmem:[%s3294_s12 + $0x2d4] ss:$8 sps:$4 sm:$0xff]  }
  0x52   : > { %1170 = vmatpush1.bf16.msra.mxu1 %v2906_v0  ;;  %1130 = vmatprep.subr.bf16.mxu0 %v2907_v1  ;;  %v3000_v0 = vld [vmem:[%s3294_s12 + $0x3d4] ss:$8 sps:$4 sm:$0xff]   ;;  %v2995_v1 = vld [vmem:[%s3294_s12 + $0x2d0] ss:$8 sps:$4 sm:$0xff]  }
  0x53   : > { %1171 = vmatprep.subr.bf16.mxu1 %v2909_v2  ;;  %v2998_v2 = vld [vmem:[%s3294_s12 + $0x3d0] ss:$8 sps:$4 sm:$0xff]  }
  0x55   : > { %1131 = vmatpush1.bf16.msra.mxu0 %v2911_v3  ;;  %v3003_v3 = vld [vmem:[%s3294_s12 + $0x2e4] ss:$8 sps:$4 sm:$0xff]  }
  0x56   : > { %1172 = vmatpush1.bf16.msra.mxu1 %v2912_v4  ;;  %1182 = vmatprep.subr.bf16.mxu0 %v2919_v5  ;;  %v3006_v4 = vld [vmem:[%s3294_s12 + $0x3e4] ss:$8 sps:$4 sm:$0xff]   ;;  %v3001_v5 = vld [vmem:[%s3294_s12 + $0x2e0] ss:$8 sps:$4 sm:$0xff]  }
  0x57   : > { %1223 = vmatprep.subr.bf16.mxu1 %v2922_v6  ;;  %v3004_v6 = vld [vmem:[%s3294_s12 + $0x3e0] ss:$8 sps:$4 sm:$0xff]  }
  0x58   : > { %1133 = vmatmul.mubr.bf16.vlgmr.msra.gmra.mrb[0].mxu0 %v2502_v7  ;;  %v3009_v7 = vld [vmem:[%s3294_s12 + $0x2f4] ss:$8 sps:$4 sm:$0xff]  }
  0x59   : > { %1174 = vmatmul.mubr.bf16.vlgmr.msra.gmra.mrb[0].mxu1 %v2504_v8  ;;  %1183 = vmatpush1.bf16.msra.mxu0 %v2917_v9  ;;  %v3012_v8 = vld [vmem:[%s3294_s12 + $0x3f4] ss:$8 sps:$4 sm:$0xff]   ;;  %v3007_v9 = vld [vmem:[%s3294_s12 + $0x2f0] ss:$8 sps:$4 sm:$0xff]  }
  0x5a   : > { %1224 = vmatpush1.bf16.msra.mxu1 %v2920_v10  ;;  %1184 = vmatprep.subr.bf16.mxu0 %v2925_v11  ;;  %v3010_v10 = vld [vmem:[%s3294_s12 + $0x3f0] ss:$8 sps:$4 sm:$0xff]   ;;  %v2506_v11 = vcombine.low %v3390_v33, %v3390_v33  ;;  %v299_v33 = vld [vmem:[#allocation2 + $0x8] sm:$0xff] }
  0x5b   : > { %1225 = vmatprep.subr.bf16.mxu1 %v2928_v12  ;;  %1214 = vmatprep.mubr.bf16.mxu0 %v2507_v35  ;;  %v2508_v12 = vcombine.low %v3393_v34, %v3393_v34 }
  0x5c   : > { %1255 = vmatprep.mubr.bf16.mxu1 %v2509_v36 }
  0x5d   : > { %1185 = vmatpush1.bf16.msra.mxu0 %v2923_v13 }
  0x5e   : > { %1226 = vmatpush1.bf16.msra.mxu1 %v2926_v14  ;;  %1186 = vmatprep.subr.bf16.mxu0 %v2931_v15 }
  0x5f   : > { %1227 = vmatprep.subr.bf16.mxu1 %v2934_v16 }
  0x61   : > { %1187 = vmatpush1.bf16.msra.mxu0 %v2929_v17 }
  0x62   : > { %1228 = vmatpush1.bf16.msra.mxu1 %v2932_v18  ;;  %1188 = vmatprep.subr.bf16.mxu0 %v2937_v19 }
  0x63   : > { %1229 = vmatprep.subr.bf16.mxu1 %v2940_v20 }
  0x65   : > { %1189 = vmatpush1.bf16.msra.mxu0 %v2935_v21 }
  0x66   : > { %1230 = vmatpush1.bf16.msra.mxu1 %v2938_v22  ;;  %1190 = vmatprep.subr.bf16.mxu0 %v2943_v23 }
  0x67   : > { %1231 = vmatprep.subr.bf16.mxu1 %v2946_v24 }
  0x69   : > { %1191 = vmatpush1.bf16.msra.mxu0 %v2941_v25 }
  0x6a   : > { %1232 = vmatpush1.bf16.msra.mxu1 %v2944_v26  ;;  %1192 = vmatprep.subr.bf16.mxu0 %v2949_v27 }
  0x6b   : > { %1233 = vmatprep.subr.bf16.mxu1 %v2952_v28  ;;  %v298_v28 = vld [vmem:[#allocation2] sm:$0xff] }
  0x6d   : > { %1193 = vmatpush1.bf16.msra.mxu0 %v2947_v29 }
  0x6e   : > { %1234 = vmatpush1.bf16.msra.mxu1 %v2950_v30  ;;  %1194 = vmatprep.subr.bf16.mxu0 %v2955_v31 }
  0x6f   : > { %1235 = vmatprep.subr.bf16.mxu1 %v2958_v32 }
  0x71   : > { %1195 = vmatpush1.bf16.msra.mxu0 %v2953_v37 }
  0x72   : > { %1236 = vmatpush1.bf16.msra.mxu1 %v2956_v38  ;;  %1196 = vmatprep.subr.bf16.mxu0 %v2961_v39  ;;  %v3017_v39 = vld [vmem:[%s3942_s3 + $0x4] ss:$8 sps:$4 sm:$0xff] (!%p2638_p6)  }
  0x73   : > { %1237 = vmatprep.subr.bf16.mxu1 %v2964_v40  ;;  %v3019_v40 = vld [vmem:[%s3942_s3] ss:$8 sps:$4 sm:$0xff] (!%p2638_p6)  }
  0x75   : > { %1197 = vmatpush1.bf16.msra.mxu0 %v2959_v41  ;;  %v3020_v41 = vld [vmem:[%s3942_s3 + $0x14] ss:$8 sps:$4 sm:$0xff] (!%p2638_p6)  }
  0x76   : > { %1238 = vmatpush1.bf16.msra.mxu1 %v2962_v42  ;;  %1198 = vmatprep.subr.bf16.mxu0 %v2967_v43  ;;  %v3022_v42 = vld [vmem:[%s3942_s3 + $0x10] ss:$8 sps:$4 sm:$0xff] (!%p2638_p6)   ;;  %v3023_v43 = vld [vmem:[%s3942_s3 + $0x24] ss:$8 sps:$4 sm:$0xff] (!%p2638_p6)  }
  0x77   : > { %1239 = vmatprep.subr.bf16.mxu1 %v2970_v44  ;;  %v3025_v44 = vld [vmem:[%s3942_s3 + $0x20] ss:$8 sps:$4 sm:$0xff] (!%p2638_p6)  }
  0x79   : > { %1199 = vmatpush1.bf16.msra.mxu0 %v2965_v45  ;;  %v3026_v45 = vld [vmem:[%s3942_s3 + $0x34] ss:$8 sps:$4 sm:$0xff] (!%p2638_p6)  }
  0x7a   : > { %1240 = vmatpush1.bf16.msra.mxu1 %v2968_v46  ;;  %1200 = vmatprep.subr.bf16.mxu0 %v2973_v47  ;;  %v1276_v46 = vlaneseq (!%p2638_p6)  ;;  %v3028_v47 = vld [vmem:[%s3942_s3 + $0x30] ss:$8 sps:$4 sm:$0xff] (!%p2638_p6)  }
  0x7b   : > { %1241 = vmatprep.subr.bf16.mxu1 %v2976_v48  ;;  %v3029_v48 = vld [vmem:[%s3942_s3 + $0x44] ss:$8 sps:$4 sm:$0xff] (!%p2638_p6)  }
  0x7d   : > { %1201 = vmatpush1.bf16.msra.mxu0 %v2971_v49  ;;  %v3469_v49 = vshrl.u32 (!%p2638_p6), %v1276_v46, 7  ;;  %v3136_v46 = vld [vmem:[%s3944_s5 + $0x268] ss:$28 sps:$4 sm:$0xff] (!%p2638_p6)  }
  0x7e   : > { %1242 = vmatpush1.bf16.msra.mxu1 %v2974_v50  ;;  %1202 = vmatprep.subr.bf16.mxu0 %v2979_v51  ;;  %v3031_v50 = vld [vmem:[%s3942_s3 + $0x40] ss:$8 sps:$4 sm:$0xff] (!%p2638_p6)   ;;  %v3032_v51 = vld [vmem:[%s3942_s3 + $0x54] ss:$8 sps:$4 sm:$0xff] (!%p2638_p6)  }
  0x7f   : > { %1243 = vmatprep.subr.bf16.mxu1 %v2982_v52  ;;  %v3478_v52 = vsub.s32 (!%p2638_p6), 1, %v3469_v49 }
  0x81   : > { %1203 = vmatpush1.bf16.msra.mxu0 %v2977_v53  ;;  %v3034_v53 = vld [vmem:[%s3942_s3 + $0x50] ss:$8 sps:$4 sm:$0xff] (!%p2638_p6)  }
  0x82   : > { %1244 = vmatpush1.bf16.msra.mxu1 %v2980_v54  ;;  %1204 = vmatprep.subr.bf16.mxu0 %v2985_v55  ;;  %v3035_v54 = vld [vmem:[%s3942_s3 + $0x64] ss:$8 sps:$4 sm:$0xff] (!%p2638_p6)  }
  0x83   : > { %1245 = vmatprep.subr.bf16.mxu1 %v2988_v56  ;;  %v3489_v56 = vld [vmem:[%s3941_s2] ss:$8 sm:$0x3] (!%p2638_p6) }
  0x85   : > { %1205 = vmatpush1.bf16.msra.mxu0 %v2983_v57  ;;  %v3037_v57 = vld [vmem:[%s3942_s3 + $0x60] ss:$8 sps:$4 sm:$0xff] (!%p2638_p6)  }
  0x86   : > { %1246 = vmatpush1.bf16.msra.mxu1 %v2986_v58  ;;  %1206 = vmatprep.subr.bf16.mxu0 %v2991_v59  ;;  %v1283_v58 = vrot.slane (!%p2638_p6), %v3489_v56, %v3478_v52  ;;  %v3065_v59 = vld [vmem:[%s3944_s5 + $0x4] ss:$28 sps:$4 sm:$0xff] (!%p2638_p6)  }
  0x87   : > { %1247 = vmatprep.subr.bf16.mxu1 %v2994_v60  ;;  %v3038_v60 = vld [vmem:[%s3942_s3 + $0x74] ss:$8 sps:$4 sm:$0xff] (!%p2638_p6)  }
  0x89   : > { %1207 = vmatpush1.bf16.msra.mxu0 %v2989_v61 }
  0x8a   : > { %1248 = vmatpush1.bf16.msra.mxu1 %v2992_v62  ;;  %1208 = vmatprep.subr.bf16.mxu0 %v2997_v63  ;;  %v3070_v62 = vld [vmem:[%s3944_s5] ss:$28 sps:$4 sm:$0xff] (!%p2638_p6)  }
  0x8b   : > { %1249 = vmatprep.subr.bf16.mxu1 %v3000_v0  ;;  %v3071_v63 = vld [vmem:[%s3944_s5 + $0x3c] ss:$28 sps:$4 sm:$0xff] (!%p2638_p6)  }
  0x8c   : > { %v3040_v0 = vld [vmem:[%s3942_s3 + $0x70] ss:$8 sps:$4 sm:$0xff] (!%p2638_p6)  }
  0x8d   : > { %1209 = vmatpush1.bf16.msra.mxu0 %v2995_v1 }
  0x8e   : > { %1250 = vmatpush1.bf16.msra.mxu1 %v2998_v2  ;;  %1210 = vmatprep.subr.bf16.mxu0 %v3003_v3  ;;  %v3041_v2 = vld [vmem:[%s3942_s3 + $0x84] ss:$8 sps:$4 sm:$0xff] (!%p2638_p6)   ;;  %v3076_v3 = vld [vmem:[%s3944_s5 + $0x38] ss:$28 sps:$4 sm:$0xff] (!%p2638_p6)  }
  0x8f   : > { %1251 = vmatprep.subr.bf16.mxu1 %v3006_v4  ;;  %v3077_v4 = vld [vmem:[%s3944_s5 + $0x74] ss:$28 sps:$4 sm:$0xff] (!%p2638_p6)  }
  0x91   : > { %1211 = vmatpush1.bf16.msra.mxu0 %v3001_v5  ;;  %v3043_v5 = vld [vmem:[%s3942_s3 + $0x80] ss:$8 sps:$4 sm:$0xff] (!%p2638_p6)  }
  0x92   : > { %1252 = vmatpush1.bf16.msra.mxu1 %v3004_v6  ;;  %1212 = vmatprep.subr.bf16.mxu0 %v3009_v7  ;;  %v3082_v6 = vld [vmem:[%s3944_s5 + $0x70] ss:$28 sps:$4 sm:$0xff] (!%p2638_p6)  }
  0x93   : > { %1253 = vmatprep.subr.bf16.mxu1 %v3012_v8  ;;  %v3083_v7 = vld [vmem:[%s3944_s5 + $0xac] ss:$28 sps:$4 sm:$0xff] (!%p2638_p6)   ;;  %v3044_v8 = vld [vmem:[%s3942_s3 + $0x94] ss:$8 sps:$4 sm:$0xff] (!%p2638_p6)  }
  0x95   : > { %1213 = vmatpush1.bf16.msra.mxu0 %v3007_v9  ;;  %v3088_v9 = vld [vmem:[%s3944_s5 + $0xa8] ss:$28 sps:$4 sm:$0xff] (!%p2638_p6)  }
  0x96   : > { %1254 = vmatpush1.bf16.msra.mxu1 %v3010_v10  ;;  %1494 = vmatprep.subr.bf16.mxu0 (!%p2638_p6), %v3017_v39  ;;  %v3046_v10 = vld [vmem:[%s3942_s3 + $0x90] ss:$8 sps:$4 sm:$0xff] (!%p2638_p6)   ;;  %v3069_v39 = vld [vmem:[%s3944_s5 + $0xc] ss:$28 sps:$4 sm:$0xff] (!%p2638_p6)  }
  0x97   : > { %2282 = vmatprep.subr.bf16.mxu1 (!%p2638_p6), %v3065_v59  ;;  %v3091_v59 = vld [vmem:[%s3944_s5 + $0xe8] ss:$28 sps:$4 sm:$0xff] (!%p2638_p6)  }
  0x98   : > { %1215 = vmatmul.mubr.bf16.vlgmr.msra.gmra.mrb[4].mxu0 %v2506_v11  ;;  %v3089_v11 = vld [vmem:[%s3944_s5 + $0xe4] ss:$28 sps:$4 sm:$0xff] (!%p2638_p6)  }
  0x99   : > { %1256 = vmatmul.mubr.bf16.vlgmr.msra.gmra.mrb[4].mxu1 %v2508_v12  ;;  %1495 = vmatpush1.bf16.msra.mxu0 (!%p2638_p6), %v3019_v40  ;;  %v3047_v12 = vld [vmem:[%s3942_s3 + $0xa4] ss:$8 sps:$4 sm:$0xff] (!%p2638_p6)   ;;  %v3125_v40 = vld [vmem:[%s3944_s5 + $0x234] ss:$28 sps:$4 sm:$0xff] (!%p2638_p6)  }
  0x9a   : > { %1496 = vmatprep.subr.bf16.mxu0 (!%p2638_p6), %v3020_v41  ;;  %2283 = vmatpush1.bf16.msra.mxu1 (!%p2638_p6), %v3070_v62  ;;  %v3130_v41 = vld [vmem:[%s3944_s5 + $0x230] ss:$28 sps:$4 sm:$0xff] (!%p2638_p6)   ;;  %v3105_v62 = vld [vmem:[%s3944_s5 + $0x15c] ss:$28 sps:$4 sm:$0xff] (!%p2638_p6)  }
  0x9b   : > { %2284 = vmatprep.subr.bf16.mxu1 (!%p2638_p6), %v3071_v63  ;;  %v3103_v63 = vld [vmem:[%s3944_s5 + $0x158] ss:$28 sps:$4 sm:$0xff] (!%p2638_p6)  }
  0x9d   : > { %1497 = vmatpush1.bf16.msra.mxu0 (!%p2638_p6), %v3022_v42  ;;  %v3067_v42 = vld [vmem:[%s3944_s5 + $0x8] ss:$28 sps:$4 sm:$0xff] (!%p2638_p6)  }
  0x9e   : > { %1498 = vmatprep.subr.bf16.mxu0 (!%p2638_p6), %v3023_v43  ;;  %2285 = vmatpush1.bf16.msra.mxu1 (!%p2638_p6), %v3076_v3  ;;  %v3131_v43 = vld [vmem:[%s3944_s5 + $0x26c] ss:$28 sps:$4 sm:$0xff] (!%p2638_p6)  }
  0x9f   : > { %2286 = vmatprep.subr.bf16.mxu1 (!%p2638_p6), %v3077_v4  ;;  %v3115_v3 = vld [vmem:[%s3944_s5 + $0x1c8] ss:$28 sps:$4 sm:$0xff] (!%p2638_p6)  }
  0xa0   : > { %v3123_v4 = vld [vmem:[%s3944_s5 + $0x204] ss:$28 sps:$4 sm:$0xff] (!%p2638_p6)  }
  0xa1   : > { %1499 = vmatpush1.bf16.msra.mxu0 (!%p2638_p6), %v3025_v44 }
  0xa2   : > { %1500 = vmatprep.subr.bf16.mxu0 (!%p2638_p6), %v3026_v45  ;;  %2287 = vmatpush1.bf16.msra.mxu1 (!%p2638_p6), %v3082_v6  ;;  %v3075_v45 = vld [vmem:[%s3944_s5 + $0x44] ss:$28 sps:$4 sm:$0xff] (!%p2638_p6)   ;;  %v3129_v6 = vld [vmem:[%s3944_s5 + $0x23c] ss:$28 sps:$4 sm:$0xff] (!%p2638_p6)  }
  0xa3   : > { %2288 = vmatprep.subr.bf16.mxu1 (!%p2638_p6), %v3083_v7  ;;  %v3127_v7 = vld [vmem:[%s3944_s5 + $0x238] ss:$28 sps:$4 sm:$0xff] (!%p2638_p6)  }
  0xa5   : > { %1501 = vmatpush1.bf16.msra.mxu0 (!%p2638_p6), %v3028_v47  ;;  %v3073_v47 = vld [vmem:[%s3944_s5 + $0x40] ss:$28 sps:$4 sm:$0xff] (!%p2638_p6)  }
  0xa6   : > { %1502 = vmatprep.subr.bf16.mxu0 (!%p2638_p6), %v3029_v48  ;;  %2289 = vmatpush1.bf16.msra.mxu1 (!%p2638_p6), %v3088_v9  ;;  %v3137_v48 = vld [vmem:[%s3944_s5 + $0x2a4] ss:$28 sps:$4 sm:$0xff] (!%p2638_p6)   ;;  %v3133_v9 = vld [vmem:[%s3944_s5 + $0x270] ss:$28 sps:$4 sm:$0xff] (!%p2638_p6)  }
  0xa7   : > { %2290 = vmatprep.subr.bf16.mxu1 (!%p2638_p6), %v3089_v11  ;;  %v3139_v11 = vld [vmem:[%s3944_s5 + $0x2a8] ss:$28 sps:$4 sm:$0xff] (!%p2638_p6)  }
  0xa9   : > { %1503 = vmatpush1.bf16.msra.mxu0 (!%p2638_p6), %v3031_v50  ;;  %v3081_v50 = vld [vmem:[%s3944_s5 + $0x7c] ss:$28 sps:$4 sm:$0xff] (!%p2638_p6)  }
  0xaa   : > { %1504 = vmatprep.subr.bf16.mxu0 (!%p2638_p6), %v3032_v51  ;;  %v3142_v51 = vld [vmem:[%s3944_s5 + $0x2a0] ss:$28 sps:$4 sm:$0xff] (!%p2638_p6)  }
  0xad   : > { %1505 = vmatpush1.bf16.msra.mxu0 (!%p2638_p6), %v3034_v53  ;;  %v3079_v53 = vld [vmem:[%s3944_s5 + $0x78] ss:$28 sps:$4 sm:$0xff] (!%p2638_p6)  }
  0xae   : > { %1506 = vmatprep.subr.bf16.mxu0 (!%p2638_p6), %v3035_v54  ;;  %v3143_v54 = vld [vmem:[%s3944_s5 + $0x2dc] ss:$28 sps:$4 sm:$0xff] (!%p2638_p6)  }
  0xb1   : > { %1507 = vmatpush1.bf16.msra.mxu0 (!%p2638_p6), %v3037_v57  ;;  %v3085_v57 = vld [vmem:[%s3944_s5 + $0xb0] ss:$28 sps:$4 sm:$0xff] (!%p2638_p6)  }
  0xb2   : > { %1508 = vmatprep.subr.bf16.mxu0 (!%p2638_p6), %v3038_v60  ;;  %v3099_v60 = vld [vmem:[%s3944_s5 + $0x124] ss:$28 sps:$4 sm:$0xff] (!%p2638_p6)  }
  0xb5   : > { %1509 = vmatpush1.bf16.msra.mxu0 (!%p2638_p6), %v3040_v0  ;;  %v3111_v0 = vld [vmem:[%s3944_s5 + $0x194] ss:$28 sps:$4 sm:$0xff] (!%p2638_p6)  }
  0xb6   : > { %1510 = vmatprep.subr.bf16.mxu0 (!%p2638_p6), %v3041_v2  ;;  %v3117_v2 = vld [vmem:[%s3944_s5 + $0x1cc] ss:$28 sps:$4 sm:$0xff] (!%p2638_p6)  }
  0xb9   : > { %1511 = vmatpush1.bf16.msra.mxu0 (!%p2638_p6), %v3043_v5  ;;  %v3121_v5 = vld [vmem:[%s3944_s5 + $0x200] ss:$28 sps:$4 sm:$0xff] (!%p2638_p6)  }
  0xba   : > { %1512 = vmatprep.subr.bf16.mxu0 (!%p2638_p6), %v3044_v8  ;;  %v3135_v8 = vld [vmem:[%s3944_s5 + $0x274] ss:$28 sps:$4 sm:$0xff] (!%p2638_p6)  }
  0xbd   : > { %1513 = vmatpush1.bf16.msra.mxu0 (!%p2638_p6), %v3046_v10  ;;  %v3141_v10 = vld [vmem:[%s3944_s5 + $0x2ac] ss:$28 sps:$4 sm:$0xff] (!%p2638_p6)  }
  0xbe   : > { %1514 = vmatprep.subr.bf16.mxu0 (!%p2638_p6), %v3047_v12  ;;  %v3147_v12 = vld [vmem:[%s3944_s5 + $0x2e4] ss:$28 sps:$4 sm:$0xff] (!%p2638_p6)  }
 0x12b   : > { %v1134_v13 = vpop.f32.mrb[0].mxu0 }
 0x12c   : > { %v1175_v14 = vpop.f32.mrb[0].mxu1  ;;  %v1136_v16 = vpop.f32.mrb[1].mxu0 }
 0x12d   : > { %v1176_v15 = vadd.f32 %v1175_v14, %v1134_v13  ;;  %v1177_v17 = vpop.f32.mrb[1].mxu1  ;;  %v1138_v19 = vpop.f32.mrb[2].mxu0  ;;  %v3049_v13 = vld [vmem:[%s3942_s3 + $0xa0] ss:$8 sps:$4 sm:$0xff] (!%p2638_p6)  }
 0x12e   : > { %v1178_v18 = vadd.f32 %v1177_v17, %v1136_v16  ;;  %v1179_v20 = vpop.f32.mrb[2].mxu1  ;;  %v1139_v21 = vpop.f32.mrb[3].mxu0  ;;  %v3094_v14 = vld [vmem:[%s3944_s5 + $0xe0] ss:$28 sps:$4 sm:$0xff] (!%p2638_p6)   ;;  %v3100_v17 = vld [vmem:[%s3944_s5 + $0x118] ss:$28 sps:$4 sm:$0xff] (!%p2638_p6)   ;;  %1515 = vmatpush1.bf16.msra.mxu0 (!%p2638_p6), %v3049_v13 }
 0x12f   : > { %v1180_v22 = vpop.f32.mrb[3].mxu1  ;;  %v3050_v16 = vld [vmem:[%s3942_s3 + $0xb4] ss:$8 sps:$4 sm:$0xff] (!%p2638_p6)   ;;  %2291 = vmatpush1.bf16.msra.mxu1 (!%p2638_p6), %v3094_v14  ;;  %v3053_v20 = vld [vmem:[%s3942_s3 + $0xc4] ss:$8 sps:$4 sm:$0xff] (!%p2638_p6)  }
 0x130   : > { %v3101_v19 = vld [vmem:[%s3944_s5 + $0x154] ss:$28 sps:$4 sm:$0xff] (!%p2638_p6)   ;;  %1516 = vmatprep.subr.bf16.mxu0 (!%p2638_p6), %v3050_v16  ;;  %v3055_v21 = vld [vmem:[%s3942_s3 + $0xc0] ss:$8 sps:$4 sm:$0xff] (!%p2638_p6)  }
 0x131   : > { %v3106_v22 = vld [vmem:[%s3944_s5 + $0x150] ss:$28 sps:$4 sm:$0xff] (!%p2638_p6)   ;;  %v3145_v13 = vld [vmem:[%s3944_s5 + $0x2e0] ss:$28 sps:$4 sm:$0xff] (!%p2638_p6)   ;;  %v3151_v16 = vld [vmem:[%s3944_s5 + $0x318] ss:$28 sps:$4 sm:$0xff] (!%p2638_p6)  }
 0x132   : > { %v3149_v14 = vld [vmem:[%s3944_s5 + $0x314] ss:$28 sps:$4 sm:$0xff] (!%p2638_p6)  }
 0x16b   : > { %v1216_v23 = vpop.f32.mrb[4].mxu0 }
 0x16c   : > { %v1257_v24 = vpop.f32.mrb[4].mxu1  ;;  %v1217_v25 = vadd.f32 %v1216_v23, %v1176_v15  ;;  %v1218_v26 = vpop.f32.mrb[5].mxu0  ;;  %v3095_v15 = vld [vmem:[%s3944_s5 + $0x11c] ss:$28 sps:$4 sm:$0xff] (!%p2638_p6)   ;;  %v3107_v23 = vld [vmem:[%s3944_s5 + $0x18c] ss:$28 sps:$4 sm:$0xff] (!%p2638_p6)  }
 0x16d   : > { %v1259_v27 = vpop.f32.mrb[5].mxu1  ;;  %v1219_v29 = vadd.f32 %v1218_v26, %v1178_v18  ;;  %v1220_v30 = vpop.f32.mrb[6].mxu0  ;;  %1271 = sbr.rel (%p2638_p6) target bundleno = 885 (0x375), region = 56  ;;  %v3052_v18 = vld [vmem:[%s3942_s3 + $0xb0] ss:$8 sps:$4 sm:$0xff] (!%p2638_p6)   ;;  %2292 = vmatprep.subr.bf16.mxu1 (!%p2638_p6), %v3095_v15 }
 0x16e   : > { %v1261_v31 = vpop.f32.mrb[6].mxu1  ;;  %v1258_v32 = vadd.f32 %v1257_v24, %v1217_v25  ;;  %v1221_v34 = vpop.f32.mrb[7].mxu0  ;;  %2293 = vmatpush1.bf16.msra.mxu1 (!%p2638_p6), %v3100_v17  ;;  %1517 = vmatpush1.bf16.msra.mxu0 (!%p2638_p6), %v3052_v18  ;;  %v3056_v24 = vld [vmem:[%s3942_s3 + $0xd4] ss:$8 sps:$4 sm:$0xff] (!%p2638_p6)   ;;  %v3581_v25 = vsub.s32 (!%p2638_p6), 0, %v3469_v49 }
 0x16f   : > { %v1262_v35 = vpop.f32.mrb[7].mxu1  ;;  %v1260_v36 = vadd.f32 %v1259_v27, %v1219_v29  ;;  %2294 = vmatprep.subr.bf16.mxu1 (!%p2638_p6), %v3101_v19  ;;  %1518 = vmatprep.subr.bf16.mxu0 (!%p2638_p6), %v3053_v20  ;;  %v3112_v26 = vld [vmem:[%s3944_s5 + $0x188] ss:$28 sps:$4 sm:$0xff] (!%p2638_p6)   ;;  %v3058_v27 = vld [vmem:[%s3942_s3 + $0xd0] ss:$8 sps:$4 sm:$0xff] (!%p2638_p6)  }
 0x170   : > { %v1264_v37 = vadd.f32 %v1258_v32, %v298_v28  ;;  %v3113_v28 = vld [vmem:[%s3944_s5 + $0x1c4] ss:$28 sps:$4 sm:$0xff] (!%p2638_p6)   ;;  %v1279_v32 = vrot.slane (!%p2638_p6), %v3489_v56, %v3581_v25  ;;  %v3119_v34 = vld [vmem:[%s3944_s5 + $0x1fc] ss:$28 sps:$4 sm:$0xff] (!%p2638_p6)   ;;  %v3154_v17 = vld [vmem:[%s3944_s5 + $0x310] ss:$28 sps:$4 sm:$0xff] (!%p2638_p6)  }
 0x171   : > { %v1265_v38 = vadd.f32 %v1260_v36, %v299_v33  ;;  %v3059_v29 = vld [vmem:[%s3942_s3 + $0xe4] ss:$8 sps:$4 sm:$0xff] (!%p2638_p6)   ;;  %v3061_v30 = vld [vmem:[%s3942_s3 + $0xe0] ss:$8 sps:$4 sm:$0xff] (!%p2638_p6)   ;;  %v3062_v35 = vld [vmem:[%s3942_s3 + $0xf4] ss:$8 sps:$4 sm:$0xff] (!%p2638_p6)  }
 0x172   : > { %1266 = vst [vmem:[#allocation2] sm:$0xff] %v1264_v37  ;;  %2295 = vmatpush1.bf16.msra.mxu1 (!%p2638_p6), %v3106_v22  ;;  %1519 = vmatpush1.bf16.msra.mxu0 (!%p2638_p6), %v3055_v21  ;;  %v3118_v33 = vld [vmem:[%s3944_s5 + $0x1c0] ss:$28 sps:$4 sm:$0xff] (!%p2638_p6)   ;;  %v3064_v36 = vld [vmem:[%s3942_s3 + $0xf0] ss:$8 sps:$4 sm:$0xff] (!%p2638_p6)  }
 0x173   : > { %1267 = vst [vmem:[#allocation2 + $0x8] sm:$0xff] %v1265_v38  ;;  %2296 = vmatprep.subr.bf16.mxu1 (!%p2638_p6), %v3107_v23  ;;  %1520 = vmatprep.subr.bf16.mxu0 (!%p2638_p6), %v3056_v24  ;;  %v3124_v38 = vld [vmem:[%s3944_s5 + $0x1f8] ss:$28 sps:$4 sm:$0xff] (!%p2638_p6)   ;;  %v3155_v18 = vld [vmem:[%s3944_s5 + $0x34c] ss:$28 sps:$4 sm:$0xff] (!%p2638_p6)  }
 0x174   : > { %v3148_v56 = vld [vmem:[%s3944_s5 + $0x2d8] ss:$28 sps:$4 sm:$0xff]   ;;  %v3157_v20 = vld [vmem:[%s3944_s5 + $0x350] ss:$28 sps:$4 sm:$0xff]   ;;  %v3160_v21 = vld [vmem:[%s3944_s5 + $0x348] ss:$28 sps:$4 sm:$0xff]  }
 0x175   : > { %v3153_v15 = vld [vmem:[%s3944_s5 + $0x31c] ss:$28 sps:$4 sm:$0xff]   ;;  %v3159_v19 = vld [vmem:[%s3944_s5 + $0x354] ss:$28 sps:$4 sm:$0xff]  }
 0x176   : > { %2297 = vmatpush1.bf16.msra.mxu1 %v3112_v26  ;;  %1521 = vmatpush1.bf16.msra.mxu0 %v3058_v27  ;;  %v3163_v22 = vld [vmem:[%s3944_s5 + $0x14] ss:$28 sps:$4 sm:$0xff]   ;;  %v1322_v24 = vld [vmem:[%s3943_s4] ss:$8 sm:$0x3] }
 0x177   : > { %2298 = vmatprep.subr.bf16.mxu1 %v3113_v28  ;;  %1522 = vmatprep.subr.bf16.mxu0 %v3059_v29  ;;  %v3164_v23 = vld [vmem:[%s3944_s5 + $0x1d8] ss:$28 sps:$4 sm:$0xff]   ;;  %v1327_v26 = vrot.slane %v1322_v24, %v3581_v25  ;;  %v1331_v27 = vrot.slane %v1322_v24, %v3478_v52 }
 0x179   : > { %v1272_v31 = vld [vmem:[#allocation2] sm:$0xff] }
 0x17a   : > { %v1273_v55 = vld [vmem:[#allocation2 + $0x8] sm:$0xff]  ;;  %v1286_v37 = vadd.f32 %v1279_v32, %v1272_v31  ;;  %2299 = vmatpush1.bf16.msra.mxu1 %v3118_v33  ;;  %1523 = vmatpush1.bf16.msra.mxu0 %v3061_v30 }
 0x17b   : > { %v1287_v61 = vadd.f32 %v1283_v58, %v1273_v55  ;;  %2300 = vmatprep.subr.bf16.mxu1 %v3119_v34  ;;  %1524 = vmatprep.subr.bf16.mxu0 %v3062_v35  ;;  %v3087_v55 = vld [vmem:[%s3944_s5 + $0xb4] ss:$28 sps:$4 sm:$0xff]   ;;  %v3093_v58 = vld [vmem:[%s3944_s5 + $0xec] ss:$28 sps:$4 sm:$0xff]  }
 0x17c   : > { %v1288_v44 = vpack.c.bf16 %v1286_v37, %v1286_v37  ;;  %v3161_v37 = vld [vmem:[%s3944_s5 + $0x10] ss:$28 sps:$4 sm:$0xff]  }
 0x17d   : > { %v1289_v1 = vpack.c.bf16 %v1287_v61, %v1287_v61  ;;  %v3097_v61 = vld [vmem:[%s3944_s5 + $0x120] ss:$28 sps:$4 sm:$0xff]  }
 0x17e   : > { %2301 = vmatpush1.bf16.msra.mxu1 %v3124_v38  ;;  %1525 = vmatpush1.bf16.msra.mxu0 %v3064_v36  ;;  %v3165_v38 = vld [vmem:[%s3944_s5 + $0x18] ss:$28 sps:$4 sm:$0xff]  }
 0x17f   : > { %1526 = vmatprep.mubr.bf16.mxu0 %v1289_v1  ;;  %2302 = vmatprep.subr.bf16.mxu1 %v3125_v40  ;;  %v3109_v1 = vld [vmem:[%s3944_s5 + $0x190] ss:$28 sps:$4 sm:$0xff]  }
 0x180   : > { %2323 = vmatprep.subr.bf16.mxu0 %v3069_v39  ;;  %v3168_v40 = vld [vmem:[%s3944_s5 + $0x4c] ss:$28 sps:$4 sm:$0xff]  }
 0x181   : > { %1527 = vmatmul.mubr.bf16.vlgmr.msra.gmra.mrb[0].mxu0 %v1288_v44  ;;  %v3173_v44 = vld [vmem:[%s3944_s5 + $0x84] ss:$28 sps:$4 sm:$0xff]  }
 0x182   : > { %2303 = vmatpush1.bf16.msra.mxu1 %v3130_v41  ;;  %2324 = vmatpush1.bf16.msra.mxu0 %v3067_v42  ;;  %v3169_v41 = vld [vmem:[%s3944_s5 + $0x210] ss:$28 sps:$4 sm:$0xff]   ;;  %v3166_v42 = vld [vmem:[%s3944_s5 + $0x48] ss:$28 sps:$4 sm:$0xff]  }
 0x183   : > { %2304 = vmatprep.subr.bf16.mxu1 %v3131_v43  ;;  %2325 = vmatprep.subr.bf16.mxu0 %v3075_v45  ;;  %v3170_v43 = vld [vmem:[%s3944_s5 + $0x50] ss:$28 sps:$4 sm:$0xff]   ;;  %v3174_v45 = vld [vmem:[%s3944_s5 + $0x248] ss:$28 sps:$4 sm:$0xff]  }
 0x186   : > { %2305 = vmatpush1.bf16.msra.mxu1 %v3136_v46  ;;  %2326 = vmatpush1.bf16.msra.mxu0 %v3073_v47  ;;  %v3171_v46 = vld [vmem:[%s3944_s5 + $0x80] ss:$28 sps:$4 sm:$0xff]   ;;  %v3175_v47 = vld [vmem:[%s3944_s5 + $0x88] ss:$28 sps:$4 sm:$0xff]  }
 0x187   : > { %2306 = vmatprep.subr.bf16.mxu1 %v3137_v48  ;;  %2327 = vmatprep.subr.bf16.mxu0 %v3081_v50  ;;  %v3178_v48 = vld [vmem:[%s3944_s5 + $0xbc] ss:$28 sps:$4 sm:$0xff]  }
 0x188   : > { %v3179_v50 = vld [vmem:[%s3944_s5 + $0x280] ss:$28 sps:$4 sm:$0xff]  }
 0x18a   : > { %2307 = vmatpush1.bf16.msra.mxu1 %v3142_v51  ;;  %2328 = vmatpush1.bf16.msra.mxu0 %v3079_v53  ;;  %v3176_v51 = vld [vmem:[%s3944_s5 + $0xb8] ss:$28 sps:$4 sm:$0xff]   ;;  %v3180_v53 = vld [vmem:[%s3944_s5 + $0xc0] ss:$28 sps:$4 sm:$0xff]  }
 0x18b   : > { %2308 = vmatprep.subr.bf16.mxu1 %v3143_v54  ;;  %2329 = vmatprep.subr.bf16.mxu0 %v3087_v55  ;;  %v3183_v54 = vld [vmem:[%s3944_s5 + $0xf4] ss:$28 sps:$4 sm:$0xff]  }
 0x18c   : > { %v3184_v55 = vld [vmem:[%s3944_s5 + $0x2b8] ss:$28 sps:$4 sm:$0xff]  }
 0x18e   : > { %2309 = vmatpush1.bf16.msra.mxu1 %v3148_v56  ;;  %2330 = vmatpush1.bf16.msra.mxu0 %v3085_v57  ;;  %v3181_v56 = vld [vmem:[%s3944_s5 + $0xf0] ss:$28 sps:$4 sm:$0xff]   ;;  %v3185_v57 = vld [vmem:[%s3944_s5 + $0xf8] ss:$28 sps:$4 sm:$0xff]  }
 0x18f   : > { %2331 = vmatprep.subr.bf16.mxu0 %v3093_v58  ;;  %2310 = vmatprep.subr.bf16.mxu1 %v3149_v14  ;;  %v3188_v58 = vld [vmem:[%s3944_s5 + $0x12c] ss:$28 sps:$4 sm:$0xff]   ;;  %v3215_v14 = vld [vmem:[%s3944_s5 + $0x2b4] ss:$28 sps:$4 sm:$0xff]  }
 0x192   : > { %2332 = vmatpush1.bf16.msra.mxu0 %v3091_v59  ;;  %2311 = vmatpush1.bf16.msra.mxu1 %v3154_v17  ;;  %v3189_v59 = vld [vmem:[%s3944_s5 + $0x2f0] ss:$28 sps:$4 sm:$0xff]   ;;  %v3216_v17 = vld [vmem:[%s3944_s5 + $0x2e8] ss:$28 sps:$4 sm:$0xff]  }
 0x193   : > { %2333 = vmatprep.subr.bf16.mxu0 %v3099_v60  ;;  %2312 = vmatprep.subr.bf16.mxu1 %v3155_v18  ;;  %v3186_v60 = vld [vmem:[%s3944_s5 + $0x128] ss:$28 sps:$4 sm:$0xff]  }
 0x194   : > { %v3221_v18 = vld [vmem:[%s3944_s5 + $0x324] ss:$28 sps:$4 sm:$0xff]  }
 0x196   : > { %2334 = vmatpush1.bf16.msra.mxu0 %v3097_v61  ;;  %2313 = vmatpush1.bf16.msra.mxu1 %v3160_v21  ;;  %v3190_v61 = vld [vmem:[%s3944_s5 + $0x130] ss:$28 sps:$4 sm:$0xff]   ;;  %v3222_v21 = vld [vmem:[%s3944_s5 + $0x358] ss:$28 sps:$4 sm:$0xff]  }
 0x197   : > { %2335 = vmatprep.subr.bf16.mxu0 %v3105_v62  ;;  %2364 = vmatprep.subr.bf16.mxu1 %v3163_v22  ;;  %v3193_v62 = vld [vmem:[%s3944_s5 + $0x164] ss:$28 sps:$4 sm:$0xff]  }
 0x198   : > { %v1667_v22 = vld [vmem:[%s3945_s6] ss:$8 sm:$0xf] }
 0x19a   : > { %2336 = vmatpush1.bf16.msra.mxu0 %v3103_v63  ;;  %v3194_v63 = vld [vmem:[%s3944_s5 + $0x328] ss:$28 sps:$4 sm:$0xff]  }
 0x19b   : > { %2337 = vmatprep.subr.bf16.mxu0 %v3111_v0  ;;  %v3191_v0 = vld [vmem:[%s3944_s5 + $0x160] ss:$28 sps:$4 sm:$0xff]  }
 0x19e   : > { %2338 = vmatpush1.bf16.msra.mxu0 %v3109_v1  ;;  %v3195_v1 = vld [vmem:[%s3944_s5 + $0x168] ss:$28 sps:$4 sm:$0xff]  }
 0x19f   : > { %2339 = vmatprep.subr.bf16.mxu0 %v3117_v2  ;;  %v3198_v2 = vld [vmem:[%s3944_s5 + $0x19c] ss:$28 sps:$4 sm:$0xff]  }
 0x1a2   : > { %2340 = vmatpush1.bf16.msra.mxu0 %v3115_v3  ;;  %v3199_v3 = vld [vmem:[%s3944_s5 + $0x360] ss:$28 sps:$4 sm:$0xff]  }
 0x1a3   : > { %2341 = vmatprep.subr.bf16.mxu0 %v3123_v4  ;;  %v3196_v4 = vld [vmem:[%s3944_s5 + $0x198] ss:$28 sps:$4 sm:$0xff]  }
 0x1a6   : > { %2342 = vmatpush1.bf16.msra.mxu0 %v3121_v5  ;;  %v3200_v5 = vld [vmem:[%s3944_s5 + $0x1a0] ss:$28 sps:$4 sm:$0xff]  }
 0x1a7   : > { %2343 = vmatprep.subr.bf16.mxu0 %v3129_v6  ;;  %v3203_v6 = vld [vmem:[%s3944_s5 + $0x1d4] ss:$28 sps:$4 sm:$0xff]  }
 0x1aa   : > { %2344 = vmatpush1.bf16.msra.mxu0 %v3127_v7  ;;  %v3201_v7 = vld [vmem:[%s3944_s5 + $0x1d0] ss:$28 sps:$4 sm:$0xff]  }
 0x1ab   : > { %2345 = vmatprep.subr.bf16.mxu0 %v3135_v8  ;;  %v3206_v8 = vld [vmem:[%s3944_s5 + $0x20c] ss:$28 sps:$4 sm:$0xff]  }
 0x1ae   : > { %2346 = vmatpush1.bf16.msra.mxu0 %v3133_v9  ;;  %v3204_v9 = vld [vmem:[%s3944_s5 + $0x208] ss:$28 sps:$4 sm:$0xff]  }
 0x1af   : > { %2347 = vmatprep.subr.bf16.mxu0 %v3141_v10  ;;  %v3209_v10 = vld [vmem:[%s3944_s5 + $0x244] ss:$28 sps:$4 sm:$0xff]  }
 0x1b2   : > { %2348 = vmatpush1.bf16.msra.mxu0 %v3139_v11  ;;  %v3207_v11 = vld [vmem:[%s3944_s5 + $0x240] ss:$28 sps:$4 sm:$0xff]  }
 0x1b3   : > { %2349 = vmatprep.subr.bf16.mxu0 %v3147_v12  ;;  %v3212_v12 = vld [vmem:[%s3944_s5 + $0x27c] ss:$28 sps:$4 sm:$0xff]  }
 0x1b6   : > { %2350 = vmatpush1.bf16.msra.mxu0 %v3145_v13  ;;  %v3210_v13 = vld [vmem:[%s3944_s5 + $0x278] ss:$28 sps:$4 sm:$0xff]  }
 0x1b7   : > { %2351 = vmatprep.subr.bf16.mxu0 %v3153_v15  ;;  %v3213_v15 = vld [vmem:[%s3944_s5 + $0x2b0] ss:$28 sps:$4 sm:$0xff]  }
 0x1ba   : > { %2352 = vmatpush1.bf16.msra.mxu0 %v3151_v16  ;;  %v3218_v16 = vld [vmem:[%s3944_s5 + $0x2ec] ss:$28 sps:$4 sm:$0xff]  }
 0x1bb   : > { %2353 = vmatprep.subr.bf16.mxu0 %v3159_v19  ;;  %v3219_v19 = vld [vmem:[%s3944_s5 + $0x320] ss:$28 sps:$4 sm:$0xff]  }
 0x1be   : > { %2354 = vmatpush1.bf16.msra.mxu0 %v3157_v20  ;;  %v3224_v20 = vld [vmem:[%s3944_s5 + $0x35c] ss:$28 sps:$4 sm:$0xff]  }
 0x1bf   : > { %2786 = vmatprep.subr.bf16.mxu0 %v3164_v23  ;;  %v1668_v23 = vld [vmem:[%s3945_s6] ss:$8 sm:$0xf0] }
 0x1c0   : > { %v1669_v24 = vor.u32 %v1668_v23, %v1667_v22 }
 0x254   : > { %v1528_v28 = vpop.f32.mrb[0].mxu0 }
 0x255   : > { %v1529_v29 = vadd.f32 %v1528_v28, %v1327_v26  ;;  %v1530_v30 = vpop.f32.mrb[1].mxu0  ;;  %v1681_v26 = vsub.s32 2, %v3469_v49  ;;  %v1674_v28 = vrot.slane %v1669_v24, %v3581_v25 }
 0x256   : > { %v1531_v31 = vadd.f32 %v1530_v30, %v1331_v27  ;;  %v1532_v32 = vpop.f32.mrb[2].mxu0  ;;  %v1685_v27 = vsub.s32 3, %v3469_v49  ;;  %v1678_v30 = vrot.slane %v1669_v24, %v3478_v52 }
 0x257   : > { %v1535_v33 = vmax.f32 %v1529_v29, 0.0  ;;  %v1533_v34 = vpop.f32.mrb[3].mxu0  ;;  %v1682_v29 = vrot.slane %v1669_v24, %v1681_v26 }
 0x258   : > { %v1536_v35 = vmax.f32 %v1531_v31, 0.0  ;;  %v1686_v31 = vrot.slane %v1669_v24, %v1685_v27 }
 0x259   : > { %v3764_v39 = vpack.c.bf16 %v1535_v33, %v1535_v33 }
 0x25a   : > { %v1538_v36 = vpack.c.bf16 %v1536_v35, %v1536_v35 }
 0x25c   : > { %2314 = vmatprep.mubr.bf16.mxu1 %v1538_v36  ;;  %2355 = vmatprep.mubr.bf16.mxu0 %v1538_v36 }
 0x25d   : > { %2315 = vmatmul.mubr.bf16.vlgmr.msra.gmra.mrb[0].mxu1 %v3764_v39  ;;  %2356 = vmatmul.mubr.bf16.vlgmr.msra.gmra.mrb[4].mxu0 %v3764_v39 }
 0x25e   : > { %2365 = vmatpush1.bf16.msra.mxu1 %v3161_v37  ;;  %2787 = vmatpush3.bf16.msra.mxu0 %v3165_v38 }
 0x25f   : > { %2396 = vmatprep.mubr.bf16.mxu1 %v1538_v36  ;;  %2437 = vmatprep.mubr.bf16.mxu0 %v1538_v36 }
 0x260   : > { %2366 = vmatprep.subr.bf16.mxu1 %v3168_v40  ;;  %2788 = vmatprep.subr.bf16.mxu0 %v3169_v41 }
 0x262   : > { %2367 = vmatpush1.bf16.msra.mxu1 %v3166_v42  ;;  %2789 = vmatpush3.bf16.msra.mxu0 %v3170_v43  ;;  %v1697_v42 = vsub.s32 6, %v3469_v49 }
 0x263   : > { %2368 = vmatprep.subr.bf16.mxu1 %v3173_v44  ;;  %2790 = vmatprep.subr.bf16.mxu0 %v3174_v45 }
 0x264   : > { %v1698_v44 = vrot.slane %v1669_v24, %v1697_v42 }
 0x266   : > { %2369 = vmatpush1.bf16.msra.mxu1 %v3171_v46  ;;  %2791 = vmatpush3.bf16.msra.mxu0 %v3175_v47 }
 0x267   : > { %2370 = vmatprep.subr.bf16.mxu1 %v3178_v48  ;;  %2792 = vmatprep.subr.bf16.mxu0 %v3179_v50 }
 0x26a   : > { %2371 = vmatpush1.bf16.msra.mxu1 %v3176_v51  ;;  %2793 = vmatpush3.bf16.msra.mxu0 %v3180_v53  ;;  %v1689_v51 = vsub.s32 4, %v3469_v49  ;;  %v1693_v53 = vsub.s32 5, %v3469_v49 }
 0x26b   : > { %2372 = vmatprep.subr.bf16.mxu1 %v3183_v54  ;;  %2794 = vmatprep.subr.bf16.mxu0 %v3184_v55 }
 0x26c   : > { %v1690_v54 = vrot.slane %v1669_v24, %v1689_v51  ;;  %v1694_v55 = vrot.slane %v1669_v24, %v1693_v53 }
 0x26e   : > { %2373 = vmatpush1.bf16.msra.mxu1 %v3181_v56  ;;  %2795 = vmatpush3.bf16.msra.mxu0 %v3185_v57 }
 0x26f   : > { %2374 = vmatprep.subr.bf16.mxu1 %v3188_v58  ;;  %2796 = vmatprep.subr.bf16.mxu0 %v3189_v59 }
 0x272   : > { %2375 = vmatpush1.bf16.msra.mxu1 %v3186_v60  ;;  %2797 = vmatpush3.bf16.msra.mxu0 %v3190_v61 }
 0x273   : > { %2376 = vmatprep.subr.bf16.mxu1 %v3193_v62  ;;  %2798 = vmatprep.subr.bf16.mxu0 %v3194_v63 }
 0x276   : > { %2377 = vmatpush1.bf16.msra.mxu1 %v3191_v0  ;;  %2799 = vmatpush3.bf16.msra.mxu0 %v3195_v1 }
 0x277   : > { %2378 = vmatprep.subr.bf16.mxu1 %v3198_v2  ;;  %2800 = vmatprep.subr.bf16.mxu0 %v3199_v3 }
 0x27a   : > { %2379 = vmatpush1.bf16.msra.mxu1 %v3196_v4  ;;  %2801 = vmatpush3.bf16.msra.mxu0 %v3200_v5 }
 0x27b   : > { %2380 = vmatprep.subr.bf16.mxu1 %v3203_v6 }
 0x27d   : > { %2438 = vmatmul.mubr.bf16.vlgmr.msra.gmra.mrb[8].mxu0 %v3764_v39 }
 0x27e   : > { %2381 = vmatpush1.bf16.msra.mxu1 %v3201_v7 }
 0x27f   : > { %2382 = vmatprep.subr.bf16.mxu1 %v3206_v8 }
 0x282   : > { %2383 = vmatpush1.bf16.msra.mxu1 %v3204_v9 }
 0x283   : > { %2384 = vmatprep.subr.bf16.mxu1 %v3209_v10 }
 0x286   : > { %2385 = vmatpush1.bf16.msra.mxu1 %v3207_v11 }
 0x287   : > { %2386 = vmatprep.subr.bf16.mxu1 %v3212_v12 }
 0x28a   : > { %2387 = vmatpush1.bf16.msra.mxu1 %v3210_v13 }
 0x28b   : > { %2388 = vmatprep.subr.bf16.mxu1 %v3215_v14 }
 0x28e   : > { %2389 = vmatpush1.bf16.msra.mxu1 %v3213_v15 }
 0x28f   : > { %2390 = vmatprep.subr.bf16.mxu1 %v3218_v16 }
 0x292   : > { %2391 = vmatpush1.bf16.msra.mxu1 %v3216_v17 }
 0x293   : > { %2392 = vmatprep.subr.bf16.mxu1 %v3221_v18 }
 0x296   : > { %2393 = vmatpush1.bf16.msra.mxu1 %v3219_v19 }
 0x297   : > { %2394 = vmatprep.subr.bf16.mxu1 %v3224_v20 }
 0x29a   : > { %2395 = vmatpush1.bf16.msra.mxu1 %v3222_v21 }
 0x29d   : > { %2397 = vmatmul.mubr.bf16.vlgmr.msra.gmra.mrb[4].mxu1 %v3764_v39 }
 0x330   : > { %v2316_v32 = vpop.f32.mrb[0].mxu1  ;;  %v2357_v33 = vpop.f32.mrb[4].mxu0 }
 0x331   : > { %v2317_v34 = vadd.f32 %v2316_v32, %v1674_v28  ;;  %v2358_v35 = vadd.f32 %v2357_v33, %v1682_v29  ;;  %v2318_v36 = vpop.f32.mrb[1].mxu1  ;;  %v2359_v37 = vpop.f32.mrb[5].mxu0 }
 0x332   : > { %v2319_v38 = vadd.f32 %v2318_v36, %v1678_v30  ;;  %v2360_v39 = vadd.f32 %v2359_v37, %v1686_v31  ;;  %v2320_v40 = vpop.f32.mrb[2].mxu1  ;;  %v2361_v41 = vpop.f32.mrb[6].mxu0 }
 0x333   : > { %2445 = vst [vmem:[%s3946_s7] sm:$0xff] %v2317_v34  ;;  %2447 = vst [vmem:[%s3946_s7 + $0x10] sm:$0xff] %v2358_v35  ;;  %v2321_v52 = vpop.f32.mrb[3].mxu1  ;;  %v2362_v25 = vpop.f32.mrb[7].mxu0 }
 0x334   : > { %2446 = vst [vmem:[%s3946_s7 + $0x8] sm:$0xff] %v2319_v38  ;;  %2448 = vst [vmem:[%s3946_s7 + $0x18] sm:$0xff] %v2360_v39 }
 0x350   : > { %v2802_v43 = vpop.f32.mrb[8].mxu0 }
 0x351   : > { %v2803_v45 = vpop.f32.mrb[9].mxu0 }
 0x352   : > { %v2804_v46 = vadd.f32 %v2803_v45, %v2802_v43  ;;  %v2805_v47 = vpop.f32.mrb[10].mxu0 }
 0x353   : > { %v2806_v48 = vpop.f32.mrb[11].mxu0 }
 0x354   : > { %v2440_v50 = vadd.f32 %v2804_v46, %v1698_v44 }
 0x356   : > { %2451 = vst [vmem:[%s3946_s7 + $0x30] sm:$0xff] %v2440_v50 }
 0x370   : > { %v2398_v56 = vpop.f32.mrb[4].mxu1 }
 0x371   : > { %v2399_v57 = vadd.f32 %v2398_v56, %v1690_v54  ;;  %v2400_v58 = vpop.f32.mrb[5].mxu1 }
 0x372   : > { %v2401_v59 = vadd.f32 %v2400_v58, %v1694_v55  ;;  %v2402_v60 = vpop.f32.mrb[6].mxu1 }
 0x373   : > { %2449 = vst [vmem:[%s3946_s7 + $0x20] sm:$0xff] %v2399_v57  ;;  %v2403_v61 = vpop.f32.mrb[7].mxu1 }
 0x374   : > { %2450 = vst [vmem:[%s3946_s7 + $0x28] sm:$0xff] %v2401_v59 }
 0x375 PF: > { %s17_s24 = sadd.s32 1, %s3231_s24  }
 0x376   : > { %p14_p7 = scmp.ge.s32.totalorder %s17_s24, 4  }
 0x378   :  { %16 = sbr.rel (!%p14_p7) target bundleno = 1 (0x1), region = 85 }

</bundles_post_ra>
